<compile_context>
chip_gen: v7x
topology: tpu7x:2x2x1
jax: 0.10.0
libtpu: 0.0.40
codegen_flags: <defaults>
</compile_context>

<pallas_src>
import jax
import jax.numpy as jnp
import numpy as np
from jax.experimental import pallas as pl
from jax.experimental.pallas import tpu as pltpu

LANES = 128


def conv_im2col_kernel(xp_ref, w_ref, y_ref, sum_ref, sq_ref, patch_ref):
    """Pass 1: 3x3 conv for one image via a single im2col MXU matmul + BN partial stats.

    xp_ref   : (1, H+2, W+2, Cin)  spatially padded NHWC input tile
    w_ref    : (9*Cin, Coutp)      im2col weights, Cout zero-padded to 128 lanes
    y_ref    : (1, H*W, Coutp)     conv output (pre-BN), f32, lane-dense
    sum_ref  : (1, 1, Coutp)       per-image channel sums      (for BN mean)
    sq_ref   : (1, 1, Coutp)       per-image channel sum-sqs   (for BN var)
    patch_ref: (H*W, 9*Cin)        VMEM scratch im2col patch
    """
    xp = xp_ref[0].astype(jnp.float32)                 # (H+2, W+2, Cin)
    Hp, Wp, Cin = xp.shape
    H, W = Hp - 2, Wp - 2
    HW = H * W

    # Build the im2col patch with only 3 relayout copies (one per kw shift); the kh
    # shift becomes a cheap leading-row slice of the flattened (H+2)*W slab.
    for kw in range(3):
        xs = xp[:, kw:kw + W, :].reshape((H + 2) * W, Cin)
        for kh in range(3):
            t = kh * 3 + kw
            patch_ref[:, t * Cin:(t + 1) * Cin] = xs[kh * W:kh * W + HW, :]

    # Single fused MXU matmul: K = 9*Cin, output lanes padded to 128 (lane dense).
    y = jnp.dot(patch_ref[...], w_ref[...], preferred_element_type=jnp.float32)

    y_ref[0] = y
    sum_ref[0] = jnp.sum(y, axis=0, keepdims=True)
    sq_ref[0] = jnp.sum(y * y, axis=0, keepdims=True)


def bn_relu_kernel(y_ref, scale_ref, shift_ref, o_ref):
    """Pass 2: y * scale + shift, ReLU; store channel-major (lane-dense, un-padded).

    y_ref    : (1, TM, Coutp)
    scale_ref: (1, Coutp)   gamma / sqrt(var + eps)   (0 on padded channels)
    shift_ref: (1, Coutp)   beta - mean * scale
    o_ref    : (1, Cout, TM)
    """
    cout = o_ref.shape[1]
    y = y_ref[0]                                              # (TM, Coutp) f32
    yn = jnp.maximum(y * scale_ref[...] + shift_ref[...], 0.0)
    # Transpose so the store's minor dim is the 128-multiple spatial chunk, and drop
    # the padded channels before writing to HBM.
    o_ref[0] = jnp.transpose(yn)[:cout, :].astype(o_ref.dtype)


def conv3x3_block(x_nchw, w_oihw, gamma, beta, eps=1e-5):
    """PyTorch-equivalent forward. x_nchw: (N, Cin, H, W); returns (N, Cout, H, W)."""
    N, Cin, H, W = x_nchw.shape
    Cout = w_oihw.shape[0]
    HW = H * W
    assert HW % 8 == 0, "H*W must be a multiple of 8 for TPU sublane tiling"
    Coutp = ((Cout + LANES - 1) // LANES) * LANES            # lane-dense channel pad

    # ---- wrapper glue: layout + padding=1 halo + im2col weight -------------------
    # TODO(synk): the halo (jnp.pad) and the NCHW boundary transpose could be folded
    # into the kernel (overlapping H-row blocks + border masking) if the surrounding
    # model stayed NHWC; kept here to preserve the PyTorch NCHW contract.
    x_nhwc = jnp.transpose(x_nchw, (0, 2, 3, 1))
    xp = jnp.pad(x_nhwc, ((0, 0), (1, 1), (1, 1), (0, 0)))

    w_hwio = jnp.transpose(w_oihw, (2, 3, 1, 0)).astype(jnp.float32)   # (3,3,Cin,Cout)
    wcat = jnp.pad(w_hwio.reshape(9 * Cin, Cout), ((0, 0), (0, Coutp - Cout)))
    gamma_p = jnp.pad(gamma.astype(jnp.float32), (0, Coutp - Cout))
    beta_p = jnp.pad(beta.astype(jnp.float32), (0, Coutp - Cout))

    # ---- pass 1: conv (single im2col matmul) + per-image BN partial sums ---------
    y, ssum, ssq = pl.pallas_call(
        conv_im2col_kernel,
        out_shape=(
            jax.ShapeDtypeStruct((N, HW, Coutp), jnp.float32),
            jax.ShapeDtypeStruct((N, 1, Coutp), jnp.float32),
            jax.ShapeDtypeStruct((N, 1, Coutp), jnp.float32),
        ),
        grid=(N,),
        in_specs=[
            pl.BlockSpec((1, H + 2, W + 2, Cin), lambda n: (n, 0, 0, 0)),
            pl.BlockSpec((9 * Cin, Coutp), lambda n: (0, 0)),
        ],
        out_specs=(
            pl.BlockSpec((1, HW, Coutp), lambda n: (n, 0, 0)),
            pl.BlockSpec((1, 1, Coutp), lambda n: (n, 0, 0)),
            pl.BlockSpec((1, 1, Coutp), lambda n: (n, 0, 0)),
        ),
        scratch_shapes=[pltpu.VMEM((HW, 9 * Cin), jnp.float32)],
        compiler_params=pltpu.CompilerParams(
            dimension_semantics=("parallel",),        # megacore-shardable on v7x
            vmem_limit_bytes=32 * 1024 * 1024,
        ),
    )(xp, wcat)

    # ---- BN batch statistics (training-mode, biased) — tiny (Coutp,) vectors -----
    cnt = jnp.float32(N * HW)
    mean = jnp.sum(ssum, axis=(0, 1)) / cnt
    var = jnp.maximum(jnp.sum(ssq, axis=(0, 1)) / cnt - mean * mean, 0.0)
    inv = jax.lax.rsqrt(var + eps)
    scale = (gamma_p * inv).reshape(1, Coutp)
    shift = (beta_p - mean * gamma_p * inv).reshape(1, Coutp)

    # ---- pass 2: normalize + ReLU, tiled, stored channel-major and un-padded -----
    TM = 128 if HW % 128 == 0 else HW
    out_flat = pl.pallas_call(
        bn_relu_kernel,
        out_shape=jax.ShapeDtypeStruct((N, Cout, HW), x_nchw.dtype),
        grid=(N, HW // TM),
        in_specs=[
            pl.BlockSpec((1, TM, Coutp), lambda n, m: (n, m, 0)),
            pl.BlockSpec((1, Coutp), lambda n, m: (0, 0)),
            pl.BlockSpec((1, Coutp), lambda n, m: (0, 0)),
        ],
        out_specs=pl.BlockSpec((1, Cout, TM), lambda n, m: (n, 0, m)),
        compiler_params=pltpu.CompilerParams(
            dimension_semantics=("parallel", "parallel"),
            vmem_limit_bytes=32 * 1024 * 1024,
        ),
    )(y, scale, shift)

    # (N, Cout, H*W) -> (N, Cout, H, W): pure metadata reshape, no transpose pass.
    return out_flat.reshape(N, Cout, H, W)


if __name__ == "__main__":
    key = jax.random.PRNGKey(0)
    kx, kw = jax.random.split(key)

    # Small shapes consistent with the module: num_in=4, num_out=8.
    N, Cin, Cout, H, W = 2, 4, 8, 16, 16
    x = jax.random.normal(kx, (N, Cin, H, W), jnp.float32)

    # Deterministic parameter init (shapes from the module __init__).
    bound = 1.0 / np.sqrt(Cin * 3 * 3)   # ~ PyTorch Conv2d kaiming-uniform bound
    w = jax.random.uniform(kw, (Cout, Cin, 3, 3), jnp.float32, -bound, bound)
    gamma = jnp.ones((Cout,), jnp.float32)   # BatchNorm2d.weight default
    beta = jnp.zeros((Cout,), jnp.float32)   # BatchNorm2d.bias default

    out = conv3x3_block(x, w, gamma, beta)
    out = jax.block_until_ready(out)

    # Pure-JAX reference (same training-mode BN semantics).
    y = jax.lax.conv_general_dilated(
        x, w, window_strides=(1, 1), padding=((1, 1), (1, 1)),
        dimension_numbers=("NCHW", "OIHW", "NCHW"))
    mean = jnp.mean(y, axis=(0, 2, 3), keepdims=True)
    var = jnp.mean((y - mean) ** 2, axis=(0, 2, 3), keepdims=True)
    ref = jnp.maximum(
        (y - mean) * jax.lax.rsqrt(var + 1e-5) * gamma.reshape(1, -1, 1, 1)
        + beta.reshape(1, -1, 1, 1), 0.0)

    np.testing.assert_allclose(np.asarray(out), np.asarray(ref),
                               rtol=1e-4, atol=1e-4)
    print("KERNEL_OK")
</pallas_src>

<mosaic_0001>
module attributes {stable_mosaic.version = 11 : i64} {
  func.func @conv_im2col_kernel(%arg0: i32, %arg1: memref<1x18x18x4xf32, #tpu.memory_space<vmem>>, %arg2: memref<36x128xf32, #tpu.memory_space<vmem>>, %arg3: memref<1x256x128xf32, #tpu.memory_space<vmem>>, %arg4: memref<1x1x128xf32, #tpu.memory_space<vmem>>, %arg5: memref<1x1x128xf32, #tpu.memory_space<vmem>>, %arg6: memref<256x36xf32, #tpu.memory_space<vmem>>) attributes {dimension_semantics = [#tpu.dimension_semantics<parallel>], iteration_bounds = array<i64: 2>, scalar_prefetch = 0 : i64, scratch_operands = 1 : i64, tpu.core_type = #tpu.core_type<tc>, window_params = [{transform_indices = @transform_0, window_bounds = array<i64: 1, 18, 18, 4>}, {pipeline_mode = #tpu.pipeline_mode<synchronous>, transform_indices = @transform_1, window_bounds = array<i64: 36, 128>}, {transform_indices = @transform_2, window_bounds = array<i64: 1, 256, 128>}, {transform_indices = @transform_3, window_bounds = array<i64: 1, 1, 128>}, {transform_indices = @transform_4, window_bounds = array<i64: 1, 1, 128>}]} {
    %c0 = arith.constant 0 : index
    %c0_0 = arith.constant 0 : index
    %c0_1 = arith.constant 0 : index
    %c0_2 = arith.constant 0 : index
    %0 = vector.load %arg1[%c0, %c0_0, %c0_1, %c0_2] : memref<1x18x18x4xf32, #tpu.memory_space<vmem>>, vector<1x18x18x4xf32>
    %1 = vector.shape_cast %0 : vector<1x18x18x4xf32> to vector<18x18x4xf32>
    %2 = vector.extract_strided_slice %1 {offsets = [0, 0, 0], sizes = [18, 16, 4], strides = [1, 1, 1]} : vector<18x18x4xf32> to vector<18x16x4xf32>
    %3 = vector.shape_cast %2 : vector<18x16x4xf32> to vector<288x4xf32>
    %4 = vector.extract_strided_slice %3 {offsets = [0, 0], sizes = [256, 4], strides = [1, 1]} : vector<288x4xf32> to vector<256x4xf32>
    %c0_3 = arith.constant 0 : index
    %c0_4 = arith.constant 0 : index
    %5 = vector.load %arg6[%c0_3, %c0_4] : memref<256x36xf32, #tpu.memory_space<vmem>>, vector<256x4xf32>
    tpu.vector_store %arg6[%c0_3, %c0_4], %4 {strides = array<i32>} : memref<256x36xf32, #tpu.memory_space<vmem>>, vector<256x4xf32>,
    %6 = vector.extract_strided_slice %3 {offsets = [16, 0], sizes = [256, 4], strides = [1, 1]} : vector<288x4xf32> to vector<256x4xf32>
    %c0_5 = arith.constant 0 : index
    %c12 = arith.constant 12 : index
    %7 = vector.load %arg6[%c0_5, %c12] : memref<256x36xf32, #tpu.memory_space<vmem>>, vector<256x4xf32>
    tpu.vector_store %arg6[%c0_5, %c12], %6 {strides = array<i32>} : memref<256x36xf32, #tpu.memory_space<vmem>>, vector<256x4xf32>,
    %8 = vector.extract_strided_slice %3 {offsets = [32, 0], sizes = [256, 4], strides = [1, 1]} : vector<288x4xf32> to vector<256x4xf32>
    %c0_6 = arith.constant 0 : index
    %c24 = arith.constant 24 : index
    %9 = vector.load %arg6[%c0_6, %c24] : memref<256x36xf32, #tpu.memory_space<vmem>>, vector<256x4xf32>
    tpu.vector_store %arg6[%c0_6, %c24], %8 {strides = array<i32>} : memref<256x36xf32, #tpu.memory_space<vmem>>, vector<256x4xf32>,
    %10 = vector.extract_strided_slice %1 {offsets = [0, 1, 0], sizes = [18, 16, 4], strides = [1, 1, 1]} : vector<18x18x4xf32> to vector<18x16x4xf32>
    %11 = vector.shape_cast %10 : vector<18x16x4xf32> to vector<288x4xf32>
    %12 = vector.extract_strided_slice %11 {offsets = [0, 0], sizes = [256, 4], strides = [1, 1]} : vector<288x4xf32> to vector<256x4xf32>
    %c0_7 = arith.constant 0 : index
    %c4 = arith.constant 4 : index
    %13 = vector.load %arg6[%c0_7, %c4] : memref<256x36xf32, #tpu.memory_space<vmem>>, vector<256x4xf32>
    tpu.vector_store %arg6[%c0_7, %c4], %12 {strides = array<i32>} : memref<256x36xf32, #tpu.memory_space<vmem>>, vector<256x4xf32>,
    %14 = vector.extract_strided_slice %11 {offsets = [16, 0], sizes = [256, 4], strides = [1, 1]} : vector<288x4xf32> to vector<256x4xf32>
    %c0_8 = arith.constant 0 : index
    %c16 = arith.constant 16 : index
    %15 = vector.load %arg6[%c0_8, %c16] : memref<256x36xf32, #tpu.memory_space<vmem>>, vector<256x4xf32>
    tpu.vector_store %arg6[%c0_8, %c16], %14 {strides = array<i32>} : memref<256x36xf32, #tpu.memory_space<vmem>>, vector<256x4xf32>,
    %16 = vector.extract_strided_slice %11 {offsets = [32, 0], sizes = [256, 4], strides = [1, 1]} : vector<288x4xf32> to vector<256x4xf32>
    %c0_9 = arith.constant 0 : index
    %c28 = arith.constant 28 : index
    %17 = vector.load %arg6[%c0_9, %c28] : memref<256x36xf32, #tpu.memory_space<vmem>>, vector<256x4xf32>
    tpu.vector_store %arg6[%c0_9, %c28], %16 {strides = array<i32>} : memref<256x36xf32, #tpu.memory_space<vmem>>, vector<256x4xf32>,
    %18 = vector.extract_strided_slice %1 {offsets = [0, 2, 0], sizes = [18, 16, 4], strides = [1, 1, 1]} : vector<18x18x4xf32> to vector<18x16x4xf32>
    %19 = vector.shape_cast %18 : vector<18x16x4xf32> to vector<288x4xf32>
    %20 = vector.extract_strided_slice %19 {offsets = [0, 0], sizes = [256, 4], strides = [1, 1]} : vector<288x4xf32> to vector<256x4xf32>
    %c0_10 = arith.constant 0 : index
    %c8 = arith.constant 8 : index
    %21 = vector.load %arg6[%c0_10, %c8] : memref<256x36xf32, #tpu.memory_space<vmem>>, vector<256x4xf32>
    tpu.vector_store %arg6[%c0_10, %c8], %20 {strides = array<i32>} : memref<256x36xf32, #tpu.memory_space<vmem>>, vector<256x4xf32>,
    %22 = vector.extract_strided_slice %19 {offsets = [16, 0], sizes = [256, 4], strides = [1, 1]} : vector<288x4xf32> to vector<256x4xf32>
    %c0_11 = arith.constant 0 : index
    %c20 = arith.constant 20 : index
    %23 = vector.load %arg6[%c0_11, %c20] : memref<256x36xf32, #tpu.memory_space<vmem>>, vector<256x4xf32>
    tpu.vector_store %arg6[%c0_11, %c20], %22 {strides = array<i32>} : memref<256x36xf32, #tpu.memory_space<vmem>>, vector<256x4xf32>,
    %24 = vector.extract_strided_slice %19 {offsets = [32, 0], sizes = [256, 4], strides = [1, 1]} : vector<288x4xf32> to vector<256x4xf32>
    %c0_12 = arith.constant 0 : index
    %c32 = arith.constant 32 : index
    %25 = vector.load %arg6[%c0_12, %c32] : memref<256x36xf32, #tpu.memory_space<vmem>>, vector<256x4xf32>
    tpu.vector_store %arg6[%c0_12, %c32], %24 {strides = array<i32>} : memref<256x36xf32, #tpu.memory_space<vmem>>, vector<256x4xf32>,
    %c0_13 = arith.constant 0 : index
    %c0_14 = arith.constant 0 : index
    %26 = vector.load %arg6[%c0_13, %c0_14] : memref<256x36xf32, #tpu.memory_space<vmem>>, vector<256x36xf32>
    %c0_15 = arith.constant 0 : index
    %c0_16 = arith.constant 0 : index
    %27 = vector.load %arg2[%c0_15, %c0_16] : memref<36x128xf32, #tpu.memory_space<vmem>>, vector<36x128xf32>
    %cst = arith.constant dense<0.000000e+00> : vector<256x128xf32>
    %28 = tpu.matmul %26, %27, %cst {dimension_numbers = #tpu.dot_dimension_numbers<[1], [0], [0], [1], [0, 0, 1, 1], [], []>} : vector<256x36xf32>, vector<36x128xf32>, vector<256x128xf32> -> vector<256x128xf32>
    %c0_17 = arith.constant 0 : index
    %c0_18 = arith.constant 0 : index
    %c0_19 = arith.constant 0 : index
    %29 = vector.load %arg3[%c0_17, %c0_18, %c0_19] : memref<1x256x128xf32, #tpu.memory_space<vmem>>, vector<1x256x128xf32>
    %30 = vector.shape_cast %29 : vector<1x256x128xf32> to vector<256x128xf32>
    %31 = vector.shape_cast %28 : vector<256x128xf32> to vector<1x256x128xf32>
    tpu.vector_store %arg3[%c0_17, %c0_18, %c0_19], %31 {strides = array<i32>} : memref<1x256x128xf32, #tpu.memory_space<vmem>>, vector<1x256x128xf32>,
    %cst_20 = arith.constant dense<0.000000e+00> : vector<128xf32>
    %32 = vector.multi_reduction <add>, %28, %cst_20 [0] : vector<256x128xf32> to vector<128xf32>
    %33 = vector.shape_cast %32 : vector<128xf32> to vector<1x128xf32>
    %c0_21 = arith.constant 0 : index
    %c0_22 = arith.constant 0 : index
    %c0_23 = arith.constant 0 : index
    %34 = vector.load %arg4[%c0_21, %c0_22, %c0_23] : memref<1x1x128xf32, #tpu.memory_space<vmem>>, vector<1x1x128xf32>
    %35 = vector.shape_cast %34 : vector<1x1x128xf32> to vector<1x128xf32>
    %36 = vector.shape_cast %33 : vector<1x128xf32> to vector<1x1x128xf32>
    tpu.vector_store %arg4[%c0_21, %c0_22, %c0_23], %36 {strides = array<i32>} : memref<1x1x128xf32, #tpu.memory_space<vmem>>, vector<1x1x128xf32>,
    %37 = arith.mulf %28, %28 : vector<256x128xf32>
    %cst_24 = arith.constant dense<0.000000e+00> : vector<128xf32>
    %38 = vector.multi_reduction <add>, %37, %cst_24 [0] : vector<256x128xf32> to vector<128xf32>
    %39 = vector.shape_cast %38 : vector<128xf32> to vector<1x128xf32>
    %c0_25 = arith.constant 0 : index
    %c0_26 = arith.constant 0 : index
    %c0_27 = arith.constant 0 : index
    %40 = vector.load %arg5[%c0_25, %c0_26, %c0_27] : memref<1x1x128xf32, #tpu.memory_space<vmem>>, vector<1x1x128xf32>
    %41 = vector.shape_cast %40 : vector<1x1x128xf32> to vector<1x128xf32>
    %42 = vector.shape_cast %39 : vector<1x128xf32> to vector<1x1x128xf32>
    tpu.vector_store %arg5[%c0_25, %c0_26, %c0_27], %42 {strides = array<i32>} : memref<1x1x128xf32, #tpu.memory_space<vmem>>, vector<1x1x128xf32>,
    return
  }
  func.func @transform_0(%arg0: i32) -> (i32, i32, i32, i32) {
    %c0_i32 = arith.constant 0 : i32
    %c0_i32_0 = arith.constant 0 : i32
    %c0_i32_1 = arith.constant 0 : i32
    %c0_i32_2 = arith.constant 0 : i32
    return %arg0, %c0_i32, %c0_i32_0, %c0_i32_1 : i32, i32, i32, i32
  }
  func.func @transform_1(%arg0: i32) -> (i32, i32) {
    %c0_i32 = arith.constant 0 : i32
    %c0_i32_0 = arith.constant 0 : i32
    %c0_i32_1 = arith.constant 0 : i32
    return %c0_i32, %c0_i32_0 : i32, i32
  }
  func.func @transform_2(%arg0: i32) -> (i32, i32, i32) {
    %c0_i32 = arith.constant 0 : i32
    %c0_i32_0 = arith.constant 0 : i32
    %c0_i32_1 = arith.constant 0 : i32
    return %arg0, %c0_i32, %c0_i32_0 : i32, i32, i32
  }
  func.func @transform_3(%arg0: i32) -> (i32, i32, i32) {
    %c0_i32 = arith.constant 0 : i32
    %c0_i32_0 = arith.constant 0 : i32
    %c0_i32_1 = arith.constant 0 : i32
    return %arg0, %c0_i32, %c0_i32_0 : i32, i32, i32
  }
  func.func @transform_4(%arg0: i32) -> (i32, i32, i32) {
    %c0_i32 = arith.constant 0 : i32
    %c0_i32_0 = arith.constant 0 : i32
    %c0_i32_1 = arith.constant 0 : i32
    return %arg0, %c0_i32, %c0_i32_0 : i32, i32, i32
  }
}

</mosaic_0001>

<bundles_post_ra>
// kernel: tpu_custom_call.1
= control target key start
LH: loop header
LB: loop body
LE: loop exit
PB: predicated region body
PF: predicated region fallthrough
CT: control target
= control target key end

     0   :  { %10 = vsyncpa [#allocation4], 0  ;;  %s4119_s0 = inlined_call_operand.vmem [shape: f32[2,18,18,4], index: 0, kind: input, shape index: {}]   ;;  %s4120_s1 = inlined_call_operand.vmem [shape: f32[36,128], index: 1, kind: input, shape index: {}]   ;;  %s4121_s2 = inlined_call_operand.hbm [shape: f32[2,256,128], index: 2, kind: output, shape index: {0}]   ;;  %s4122_s3 = inlined_call_operand.hbm [shape: f32[2,1,128], index: 3, kind: output, shape index: {1}]   ;;  %s4123_s4 = inlined_call_operand.hbm [shape: f32[2,1,128], index: 4, kind: output, shape index: {2}]  }
   0x1   :  { %12 = vsyncpa [#allocation4 + $0x1], 0 }
   0x2   :  { %13 = vsyncpa [#allocation6], 0 }
   0x3   :  { %15 = vsyncpa [#allocation6 + $0x1], 0  ;;  %s2613_s15 = smov 0   ;;  %s2615_s16 = smov 0  }
   0x4   :  { %s2617_s17 = smov 0   ;;  %s2619_s18 = smov 0  }
   0x5 LB: > { %s2634_s19 = sadd.s32 4294967295, %s2574_s18   ;;  %s2233_s20 = sadd.s32 4294967294, %s2574_s18   ;;  %s2574_s18 = sphi %s2619_s18, %s4129_s18   ;;  %s2570_s17 = sphi %s2617_s17, %s4128_s17   ;;  %s2566_s16 = sphi %s2615_s16, %s4127_s16   ;;  %s2562_s15 = sphi %s2613_s15, %s4126_s15  }
   0x6   : > { %s2638_s21 = sadd.s32 1, %s2574_s18   ;;  %s75_s22 = sadd.s32 1, %s2570_s17 }
   0x7   : > { %s72_s23 = ssub.s32 %s2574_s18, %s2638_s21  ;;  %p85_p0 = scmp.ne.s32.totalorder %s2570_s17, %s2566_s16 }
   0x8   : > { %p73_p1 = scmp.eq.s32.totalorder %s72_s23, 0  ;;  %p86_p2 = scmp.eq.s32.totalorder %s2634_s19, 1 }
   0x9   : > { %p91_p3 = scmp.ne.s32.totalorder %s2566_s16, %s2562_s15  ;;  %p92_p4 = scmp.eq.s32.totalorder %s2233_s20, 1 }
   0xa   : > { %s2651_s24 = scalar_select %p73_p1, %s2570_s17, %s75_s22  }
   0xb   : > { %p2653_p5 = por %p86_p2, %p85_p0  ;;  %p2657_p6 = por %p92_p4, %p91_p3 }
   0xc   : > { %p2236_p7 = scmp.ge.s32.totalorder %s2574_s18, 1  ;;  %p173_p8 = scmp.lt.s32.totalorder %s2574_s18, 3 }
   0xe   : > { %p174_p9 = pnand %p2236_p7, %p173_p8 }
   0xf   : > { %p207_p10 = scmp.lt.s32.totalorder (!%p174_p9), %s2634_s19, 1  ;;  %vm266_vm0 = vcmask (!%p174_p9), 31744   ;;  %s2576_s6 = smov (!%p174_p9), 12   ;;  %vm611_vm1 = vcmask (!%p174_p9), 1046528   ;;  %vm1089_vm2 = vcmask (!%p174_p9), 1045504   ;;  %vm427_vm3 = vcmask (!%p174_p9), 130144  }
  0x10   : > { %177 = sbr.rel (%p174_p9) target bundleno = 937 (0x3a9), region = 28  ;;  %s2577_s7 = smov (!%p174_p9), 24   ;;  %vm1701_vm4 = vcmask (!%p174_p9), 1043456   ;;  %vm558_vm5 = vcmask (!%p174_p9), 228544   ;;  %vm798_vm6 = vcmask (!%p174_p9), 64544   ;;  %vm927_vm7 = vcmask (!%p174_p9), 162944  }
  0x11   : > { %s2578_s8 = smov (!%p174_p9), 4   ;;  %s2579_s9 = smov (!%p174_p9), 16   ;;  %vm1056_vm8 = vcmask (!%p174_p9), 261344   ;;  %vm1276_vm9 = vcmask (!%p174_p9), 97344   ;;  %vm1405_vm10 = vcmask (!%p174_p9), 195744   ;;  %vm1534_vm11 = vcmask (!%p174_p9), 294144  }
  0x12   : > { %s2580_s10 = smov (!%p174_p9), 28   ;;  %s2581_s22 = smov (!%p174_p9), 8   ;;  %vm1604_vm12 = vcmask (!%p174_p9), 293888  }
  0x13   : > { %s2582_s30 = smov (!%p174_p9), 20   ;;  %s2583_s11 = smov (!%p174_p9), 32  }
  0x14   : > { %s2584_s29 = smov (!%p174_p9), [#allocation3]  }
  0x17   : > { %s208_s27 = scalar_select %p207_p10, %s2634_s19, 1 }
  0x19   : > { %s2389_s28 = smul.u32 432, %s208_s27 }
  0x1b   : > { %s2668_s5 = scalar_lea.vmem %s4119_s0, %s2389_s28 }
  0x1c   : > { %v2671_v0 = vld [vmem:[%s2668_s5 + $0x30] sm:$0xff]  ;;  %v2674_v1 = vld [vmem:[%s2668_s5 + $0x18] sm:$0xff]  ;;  %v2684_v3 = vld [vmem:[%s2668_s5 + $0x20] sm:$0xff] }
  0x1d   : > { %v2677_v2 = vld [vmem:[%s2668_s5 + $0x38] sm:$0xff]  ;;  %335 = vrot.lane.b32.xlu1 %v2671_v0, %s2576_s6  ;;  %331 = vrot.lane.b32.xlu0 %v2674_v1, %s2576_s6  ;;  %v2687_v4 = vld [vmem:[%s2668_s5 + $0x50] sm:$0xff]  ;;  %269 = vst.msk [vmem:[#allocation2 + $0x10] sm:$0xff] %vm266_vm0, %v2674_v1  ;;  %271 = vst.msk [vmem:[#allocation2 + $0x20] sm:$0xff] %vm266_vm0, %v2671_v0  ;;  %v618_v8 = vrot.slane %v2684_v3, 1  ;;  %v617_v9 = vrot.slane %v2674_v1, 1 }
  0x1e   : > { %272 = vst.msk [vmem:[#allocation2 + $0x28] sm:$0xff] %vm266_vm0, %v2677_v2  ;;  %v2696_v5 = vld [vmem:[%s2668_s5 + $0x48] sm:$0xff]  ;;  %v2702_v7 = vld [vmem:[%s2668_s5 + $0x60] sm:$0xff]  ;;  %270 = vst.msk [vmem:[#allocation2 + $0x18] sm:$0xff] %vm266_vm0, %v2684_v3  ;;  %v623_v22 = vrot.slane %v2677_v2, 1  ;;  %v622_v23 = vrot.slane %v2671_v0, 1 }
  0x1f   : > { %v2699_v6 = vld [vmem:[%s2668_s5 + $0x68] sm:$0xff]  ;;  %274 = vst.msk [vmem:[#allocation2 + $0x38] sm:$0xff] %vm266_vm0, %v2687_v4  ;;  %v2711_v10 = vld [vmem:[%s2668_s5 + $0x80] sm:$0xff]  ;;  %v2714_v11 = vld [vmem:[%s2668_s5 + $0x78] sm:$0xff]  ;;  %v2743_v16 = vsel %vm611_vm1, %v617_v9, %v618_v8  ;;  %v1095_v44 = vrot.slane %v2674_v1, 2  ;;  %v1096_v45 = vrot.slane %v2684_v3, 2 }
  0x20   : > { %v2717_v12 = vld [vmem:[%s2668_s5 + $0x98] sm:$0xff]  ;;  %273 = vst.msk [vmem:[#allocation2 + $0x30] sm:$0xff] %vm266_vm0, %v2696_v5  ;;  %275 = vst.msk [vmem:[#allocation2 + $0x40] sm:$0xff] %vm266_vm0, %v2702_v7  ;;  %v2726_v13 = vld [vmem:[%s2668_s5 + $0x90] sm:$0xff]  ;;  %v2809_v30 = vsel %vm611_vm1, %v622_v23, %v623_v22  ;;  %v1100_v47 = vrot.slane %v2671_v0, 2  ;;  %v1101_v48 = vrot.slane %v2677_v2, 2 }
  0x21   : > { %276 = vst.msk [vmem:[#allocation2 + $0x48] sm:$0xff] %vm266_vm0, %v2699_v6  ;;  %v2729_v14 = vld [vmem:[%s2668_s5 + $0xb0] sm:$0xff]  ;;  %v2732_v15 = vld [vmem:[%s2668_s5 + $0xa8] sm:$0xff]  ;;  %277 = vst.msk [vmem:[#allocation2 + $0x50] sm:$0xff] %vm266_vm0, %v2714_v11  ;;  %337 = vrot.lane.b32.xlu1 %v2677_v2, %s2576_s6  ;;  %333 = vrot.lane.b32.xlu0 %v2684_v3, %s2576_s6  ;;  %v2890_v46 = vsel %vm1089_vm2, %v1095_v44, %v1096_v45 }
  0x22   : > { %278 = vst.msk [vmem:[#allocation2 + $0x58] sm:$0xff] %vm266_vm0, %v2711_v10  ;;  %280 = vst.msk [vmem:[#allocation2 + $0x68] sm:$0xff] %vm266_vm0, %v2717_v12  ;;  %v2750_v17 = vld [vmem:[%s2668_s5 + $0xc8] sm:$0xff]  ;;  %v2753_v18 = vld [vmem:[%s2668_s5 + $0xc0] sm:$0xff]  ;;  %v2905_v49 = vsel %vm1089_vm2, %v1100_v47, %v1101_v48  ;;  %v627_v47 = vrot.slane %v2696_v5, 1 }
  0x23   : > { %279 = vst.msk [vmem:[#allocation2 + $0x60] sm:$0xff] %vm266_vm0, %v2726_v13  ;;  %281 = vst.msk [vmem:[#allocation2 + $0x70] sm:$0xff] %vm266_vm0, %v2732_v15  ;;  %v2762_v19 = vld [vmem:[%s2668_s5 + $0xe0] sm:$0xff]  ;;  %v2765_v20 = vld [vmem:[%s2668_s5 + $0xd8] sm:$0xff] }
  0x24   : > { %282 = vst.msk [vmem:[#allocation2 + $0x78] sm:$0xff] %vm266_vm0, %v2729_v14  ;;  %v2768_v21 = vld [vmem:[%s2668_s5 + $0xf8] sm:$0xff]  ;;  %283 = vst.msk [vmem:[#allocation2 + $0x80] sm:$0xff] %vm266_vm0, %v2753_v18  ;;  %v2777_v24 = vld [vmem:[%s2668_s5 + $0xf0] sm:$0xff] }
  0x25   : > { %284 = vst.msk [vmem:[#allocation2 + $0x88] sm:$0xff] %vm266_vm0, %v2750_v17  ;;  %v2780_v25 = vld [vmem:[%s2668_s5 + $0x110] sm:$0xff]  ;;  %v2783_v26 = vld [vmem:[%s2668_s5 + $0x108] sm:$0xff]  ;;  %285 = vst.msk [vmem:[#allocation2 + $0x90] sm:$0xff] %vm266_vm0, %v2765_v20  ;;  %341 = vrot.lane.b32.xlu1 %v2687_v4, %s2576_s6  ;;  %339 = vrot.lane.b32.xlu0 %v2696_v5, %s2576_s6 }
  0x26   : > { %286 = vst.msk [vmem:[#allocation2 + $0x98] sm:$0xff] %vm266_vm0, %v2762_v19  ;;  %288 = vst.msk [vmem:[#allocation2 + $0xa8] sm:$0xff] %vm266_vm0, %v2768_v21  ;;  %v2792_v27 = vld [vmem:[%s2668_s5 + $0x128] sm:$0xff]  ;;  %v2795_v28 = vld [vmem:[%s2668_s5 + $0x120] sm:$0xff] }
  0x27   : > { %v2798_v29 = vld [vmem:[%s2668_s5 + $0x140] sm:$0xff]  ;;  %287 = vst.msk [vmem:[#allocation2 + $0xa0] sm:$0xff] %vm266_vm0, %v2777_v24  ;;  %289 = vst.msk [vmem:[#allocation2 + $0xb0] sm:$0xff] %vm266_vm0, %v2783_v26  ;;  %v2816_v31 = vld [vmem:[%s2668_s5 + $0x138] sm:$0xff] }
  0x28   : > { %290 = vst.msk [vmem:[#allocation2 + $0xb8] sm:$0xff] %vm266_vm0, %v2780_v25  ;;  %v2819_v32 = vld [vmem:[%s2668_s5 + $0x158] sm:$0xff]  ;;  %291 = vst.msk [vmem:[#allocation2 + $0xc0] sm:$0xff] %vm266_vm0, %v2795_v28  ;;  %v2828_v33 = vld [vmem:[%s2668_s5 + $0x150] sm:$0xff] }
  0x29   : > { %292 = vst.msk [vmem:[#allocation2 + $0xc8] sm:$0xff] %vm266_vm0, %v2792_v27  ;;  %294 = vst.msk [vmem:[#allocation2 + $0xd8] sm:$0xff] %vm266_vm0, %v2798_v29  ;;  %v2831_v34 = vld [vmem:[%s2668_s5 + $0x170] sm:$0xff]  ;;  %v2834_v35 = vld [vmem:[%s2668_s5 + $0x168] sm:$0xff]  ;;  %345 = vrot.lane.b32.xlu1 %v2699_v6, %s2576_s6  ;;  %343 = vrot.lane.b32.xlu0 %v2702_v7, %s2576_s6 }
  0x2a   : > { %293 = vst.msk [vmem:[#allocation2 + $0xd0] sm:$0xff] %vm266_vm0, %v2816_v31  ;;  %296 = vst.msk [vmem:[#allocation2 + $0xe8] sm:$0xff] %vm266_vm0, %v2819_v32  ;;  %v212_v36 = vld [vmem:[%s2668_s5] sm:$0xff]  ;;  %v2849_v37 = vld [vmem:[%s2668_s5 + $0x8] sm:$0xff] }
  0x2b   : > { %295 = vst.msk [vmem:[#allocation2 + $0xe0] sm:$0xff] %vm266_vm0, %v2828_v33  ;;  %297 = vst.msk [vmem:[#allocation2 + $0xf0] sm:$0xff] %vm266_vm0, %v2834_v35  ;;  %v613_v38 = vrot.slane %v2849_v37, 1  ;;  %v612_v39 = vrot.slane %v212_v36, 1  ;;  %v1090_v41 = vrot.slane %v212_v36, 2  ;;  %v1091_v42 = vrot.slane %v2849_v37, 2 }
  0x2c   : > { %298 = vst.msk [vmem:[#allocation2 + $0xf8] sm:$0xff] %vm266_vm0, %v2831_v34  ;;  %267 = vst.msk [vmem:[#allocation2] sm:$0xff] %vm266_vm0, %v212_v36  ;;  %v261_v50 = vld [vmem:[%s2668_s5 + $0x188] sm:$0xff]  ;;  %v260_v51 = vld [vmem:[%s2668_s5 + $0x180] sm:$0xff] }
  0x2d   : > { %268 = vst.msk [vmem:[#allocation2 + $0x8] sm:$0xff] %vm266_vm0, %v2849_v37  ;;  %v2861_v40 = vsel %vm611_vm1, %v612_v39, %v613_v38  ;;  %349 = vrot.lane.b32.xlu1 %v2711_v10, %s2576_s6  ;;  %347 = vrot.lane.b32.xlu0 %v2714_v11, %s2576_s6  ;;  %v2879_v43 = vsel %vm1089_vm2, %v1090_v41, %v1091_v42  ;;  %v2990_v56 = vld [vmem:[%s2668_s5 + $0x10] sm:$0x3]  ;;  %v264_v57 = vld [vmem:[%s2668_s5 + $0x1a0] sm:$0xff] }
  0x2e   : > { %v263_v58 = vld [vmem:[%s2668_s5 + $0x198] sm:$0xff]  ;;  %v615_v59 = vrot.slane %v2990_v56, 1  ;;  %v3000_v62 = vld [vmem:[%s2668_s5 + $0x28] sm:$0x3]  ;;  %v3011_v23 = vld [vmem:[%s2668_s5 + $0x40] sm:$0x3] }
  0x2f   : > { %v3023_v44 = vld [vmem:[%s2668_s5 + $0x58] sm:$0x3]  ;;  %v1603_v3 = vld [vmem:[%s4120_s1 + $0x20] sm:$0xf] }
  0x30   : > { %v616_v63 = vsel %vm611_vm1, %v613_v38, %v615_v59  ;;  %v625_v38 = vrot.slane %v3011_v23, 1 }
  0x31   : > { %353 = vrot.lane.b32.xlu1 %v2717_v12, %s2576_s6  ;;  %351 = vrot.lane.b32.xlu0 %v2726_v13, %s2576_s6 }
  0x35   : > { %357 = vrot.lane.b32.xlu1 %v2729_v14, %s2576_s6  ;;  %355 = vrot.lane.b32.xlu0 %v2732_v15, %s2576_s6 }
  0x39   : > { %361 = vrot.lane.b32.xlu1 %v2750_v17, %s2576_s6  ;;  %359 = vrot.lane.b32.xlu0 %v2753_v18, %s2576_s6 }
  0x3d   : > { %365 = vrot.lane.b32.xlu1 %v2762_v19, %s2576_s6  ;;  %363 = vrot.lane.b32.xlu0 %v2765_v20, %s2576_s6 }
  0x41   : > { %369 = vrot.lane.b32.xlu1 %v2768_v21, %s2576_s6  ;;  %367 = vrot.lane.b32.xlu0 %v2777_v24, %s2576_s6 }
  0x45   : > { %373 = vrot.lane.b32.xlu1 %v2780_v25, %s2576_s6  ;;  %371 = vrot.lane.b32.xlu0 %v2783_v26, %s2576_s6 }
  0x49   : > { %377 = vrot.lane.b32.xlu1 %v2792_v27, %s2576_s6  ;;  %375 = vrot.lane.b32.xlu0 %v2795_v28, %s2576_s6 }
  0x4d   : > { %381 = vrot.lane.b32.xlu1 %v2798_v29, %s2576_s6  ;;  %379 = vrot.lane.b32.xlu0 %v2816_v31, %s2576_s6 }
  0x51   : > { %385 = vrot.lane.b32.xlu1 %v2819_v32, %s2576_s6  ;;  %383 = vrot.lane.b32.xlu0 %v2828_v33, %s2576_s6 }
  0x55   : > { %389 = vrot.lane.b32.xlu1 %v2831_v34, %s2576_s6  ;;  %387 = vrot.lane.b32.xlu0 %v2834_v35, %s2576_s6 }
  0x59   : > { %393 = vrot.lane.b32.xlu1 %v261_v50, %s2576_s6  ;;  %391 = vrot.lane.b32.xlu0 %v260_v51, %s2576_s6 }
  0x5d   : > { %464 = vrot.lane.b32.xlu1 %v2677_v2, %s2577_s7  ;;  %462 = vrot.lane.b32.xlu0 %v2671_v0, %s2577_s7  ;;  %v620_v0 = vrot.slane %v3000_v62, 1 }
  0x5f   : > { %v621_v36 = vsel %vm611_vm1, %v618_v8, %v620_v0  ;;  %v3035_v8 = vsel %vm611_vm1, %v623_v22, %v625_v38  ;;  %v637_v0 = vrot.slane %v2714_v11, 1 }
  0x61   : > { %468 = vrot.lane.b32.xlu1 %v2687_v4, %s2577_s7  ;;  %466 = vrot.lane.b32.xlu0 %v2696_v5, %s2577_s7 }
  0x65   : > { %472 = vrot.lane.b32.xlu1 %v2699_v6, %s2577_s7  ;;  %470 = vrot.lane.b32.xlu0 %v2702_v7, %s2577_s7 }
  0x69   : > { %476 = vrot.lane.b32.xlu1 %v2711_v10, %s2577_s7  ;;  %474 = vrot.lane.b32.xlu0 %v2714_v11, %s2577_s7 }
  0x6d   : > { %480 = vrot.lane.b32.xlu1 %v2717_v12, %s2577_s7  ;;  %478 = vrot.lane.b32.xlu0 %v2726_v13, %s2577_s7 }
  0x71   : > { %484 = vrot.lane.b32.xlu1 %v2729_v14, %s2577_s7  ;;  %482 = vrot.lane.b32.xlu0 %v2732_v15, %s2577_s7 }
  0x75   : > { %488 = vrot.lane.b32.xlu1 %v2750_v17, %s2577_s7  ;;  %486 = vrot.lane.b32.xlu0 %v2753_v18, %s2577_s7 }
  0x79   : > { %492 = vrot.lane.b32.xlu1 %v2762_v19, %s2577_s7  ;;  %490 = vrot.lane.b32.xlu0 %v2765_v20, %s2577_s7 }
  0x7d   : > { %496 = vrot.lane.b32.xlu1 %v2768_v21, %s2577_s7  ;;  %494 = vrot.lane.b32.xlu0 %v2777_v24, %s2577_s7 }
  0x81   : > { %500 = vrot.lane.b32.xlu1 %v2780_v25, %s2577_s7  ;;  %498 = vrot.lane.b32.xlu0 %v2783_v26, %s2577_s7 }
  0x85   : > { %504 = vrot.lane.b32.xlu1 %v2792_v27, %s2577_s7  ;;  %502 = vrot.lane.b32.xlu0 %v2795_v28, %s2577_s7 }
  0x89   : > { %508 = vrot.lane.b32.xlu1 %v2798_v29, %s2577_s7  ;;  %506 = vrot.lane.b32.xlu0 %v2816_v31, %s2577_s7 }
  0x8d   : > { %512 = vrot.lane.b32.xlu1 %v2819_v32, %s2577_s7  ;;  %510 = vrot.lane.b32.xlu0 %v2828_v33, %s2577_s7 }
  0x8f   : > { %v336_v52 = vpop.permute.xlu1 %335  ;;  %v332_v53 = vpop.permute.xlu0 %331 }
  0x90   : > { %430 = vst.msk [vmem:[#allocation2 + $0x10] sm:$0xff] %vm427_vm3, %v336_v52  ;;  %428 = vst.msk [vmem:[#allocation2] sm:$0xff] %vm427_vm3, %v332_v53  ;;  %v3039_v53 = vld [vmem:[%s2668_s5 + $0x70] sm:$0x3] }
  0x91   : > { %516 = vrot.lane.b32.xlu1 %v2831_v34, %s2577_s7  ;;  %514 = vrot.lane.b32.xlu0 %v2834_v35, %s2577_s7 }
  0x93   : > { %v338_v54 = vpop.permute.xlu1 %337  ;;  %v334_v55 = vpop.permute.xlu0 %333 }
  0x94   : > { %431 = vst.msk [vmem:[#allocation2 + $0x18] sm:$0xff] %vm427_vm3, %v338_v54  ;;  %429 = vst.msk [vmem:[#allocation2 + $0x8] sm:$0xff] %vm427_vm3, %v334_v55  ;;  %v633_v55 = vrot.slane %v2699_v6, 1 }
  0x95   : > { %520 = vrot.lane.b32.xlu1 %v261_v50, %s2577_s7  ;;  %518 = vrot.lane.b32.xlu0 %v260_v51, %s2577_s7  ;;  %v630_v50 = vrot.slane %v3023_v44, 1 }
  0x97   : > { %v342_v60 = vpop.permute.xlu1 %341  ;;  %v340_v61 = vpop.permute.xlu0 %339 }
  0x98   : > { %433 = vst.msk [vmem:[#allocation2 + $0x28] sm:$0xff] %vm427_vm3, %v342_v60  ;;  %432 = vst.msk [vmem:[#allocation2 + $0x20] sm:$0xff] %vm427_vm3, %v340_v61 }
  0x99   : > { %524 = vrot.lane.b32.xlu1 %v264_v57, %s2577_s7  ;;  %522 = vrot.lane.b32.xlu0 %v263_v58, %s2577_s7  ;;  %v635_v57 = vrot.slane %v3039_v53, 1  ;;  %v632_v58 = vrot.slane %v2702_v7, 1 }
  0x9b   : > { %v346_v1 = vpop.permute.xlu1 %345  ;;  %v344_v9 = vpop.permute.xlu0 %343  ;;  %v3063_v61 = vsel %vm611_vm1, %v633_v55, %v635_v57  ;;  %v1600_v57 = vld [vmem:[%s4120_s1 + $0x8] sm:$0xff] }
  0x9c   : > { %435 = vst.msk [vmem:[#allocation2 + $0x38] sm:$0xff] %vm427_vm3, %v346_v1  ;;  %434 = vst.msk [vmem:[#allocation2 + $0x30] sm:$0xff] %vm427_vm3, %v344_v9  ;;  %v638_v1 = vrot.slane %v2711_v10, 1 }
  0x9d   : > { %704 = vrot.lane.b32.xlu1 %v616_v63, %s2578_s8  ;;  %702 = vrot.lane.b32.xlu0 %v2861_v40, %s2578_s8  ;;  %v628_v40 = vrot.slane %v2687_v4, 1  ;;  %v3066_v63 = vsel %vm611_vm1, %v632_v58, %v633_v55 }
  0x9f   : > { %v350_v39 = vpop.permute.xlu1 %349  ;;  %v348_v41 = vpop.permute.xlu0 %347  ;;  %v3048_v54 = vsel %vm611_vm1, %v627_v47, %v628_v40  ;;  %v3051_v22 = vsel %vm611_vm1, %v628_v40, %v630_v50 }
  0xa0   : > { %437 = vst.msk [vmem:[#allocation2 + $0x48] sm:$0xff] %vm427_vm3, %v350_v39  ;;  %436 = vst.msk [vmem:[#allocation2 + $0x40] sm:$0xff] %vm427_vm3, %v348_v41  ;;  %v3079_v39 = vsel %vm611_vm1, %v637_v0, %v638_v1  ;;  %v1601_v0 = vld [vmem:[%s4120_s1 + $0x10] sm:$0xff] }
  0xa1   : > { %708 = vrot.lane.b32.xlu1 %v621_v36, %s2578_s8  ;;  %706 = vrot.lane.b32.xlu0 %v2743_v16, %s2578_s8 }
  0xa3   : > { %v354_v51 = vpop.permute.xlu1 %353  ;;  %v352_v52 = vpop.permute.xlu0 %351 }
  0xa4   : > { %439 = vst.msk [vmem:[#allocation2 + $0x58] sm:$0xff] %vm427_vm3, %v354_v51  ;;  %438 = vst.msk [vmem:[#allocation2 + $0x50] sm:$0xff] %vm427_vm3, %v352_v52  ;;  %v1093_v51 = vrot.slane %v2990_v56, 2 }
  0xa5   : > { %712 = vrot.lane.b32.xlu1 %v3035_v8, %s2578_s8  ;;  %710 = vrot.lane.b32.xlu0 %v2809_v30, %s2578_s8 }
  0xa6   : > { %v1094_v56 = vsel %vm1089_vm2, %v1091_v42, %v1093_v51  ;;  %v1106_v51 = vrot.slane %v2687_v4, 2 }
  0xa7   : > { %v358_v59 = vpop.permute.xlu1 %357  ;;  %v356_v60 = vpop.permute.xlu0 %355 }
  0xa8   : > { %441 = vst.msk [vmem:[#allocation2 + $0x68] sm:$0xff] %vm427_vm3, %v358_v59  ;;  %440 = vst.msk [vmem:[#allocation2 + $0x60] sm:$0xff] %vm427_vm3, %v356_v60 }
  0xa9   : > { %716 = vrot.lane.b32.xlu1 %v3051_v22, %s2578_s8  ;;  %714 = vrot.lane.b32.xlu0 %v3048_v54, %s2578_s8 }
  0xab   : > { %v362_v9 = vpop.permute.xlu1 %361  ;;  %v360_v38 = vpop.permute.xlu0 %359 }
  0xac   : > { %443 = vst.msk [vmem:[#allocation2 + $0x78] sm:$0xff] %vm427_vm3, %v362_v9  ;;  %442 = vst.msk [vmem:[#allocation2 + $0x70] sm:$0xff] %vm427_vm3, %v360_v38 }
  0xad   : > { %720 = vrot.lane.b32.xlu1 %v3063_v61, %s2578_s8  ;;  %718 = vrot.lane.b32.xlu0 %v3066_v63, %s2578_s8 }
  0xaf   : > { %v366_v41 = vpop.permute.xlu1 %365  ;;  %v364_v40 = vpop.permute.xlu0 %363 }
  0xb0   : > { %445 = vst.msk [vmem:[#allocation2 + $0x88] sm:$0xff] %vm427_vm3, %v366_v41  ;;  %444 = vst.msk [vmem:[#allocation2 + $0x80] sm:$0xff] %vm427_vm3, %v364_v40 }
  0xb1   : > { %831 = vrot.lane.b32.xlu1 %v2743_v16, %s2579_s9  ;;  %722 = vrot.lane.b32.xlu0 %v3079_v39, %s2578_s8  ;;  %v1599_v16 = vld [vmem:[%s4120_s1] sm:$0xff] }
  0xb2   : > { %v2375_v58 = vpack.c.bf16 %v1600_v57, %v1599_v16  ;;  %v1108_v16 = vrot.slane %v3023_v44, 2 }
  0xb3   : > { %v370_v47 = vpop.permute.xlu1 %369  ;;  %v368_v50 = vpop.permute.xlu0 %367 }
  0xb4   : > { %447 = vst.msk [vmem:[#allocation2 + $0x98] sm:$0xff] %vm427_vm3, %v370_v47  ;;  %446 = vst.msk [vmem:[#allocation2 + $0x90] sm:$0xff] %vm427_vm3, %v368_v50  ;;  %2376 = vmatprep.subr.bf16.mxu0 %v2375_v58  ;;  %2383 = vmatprep.subr.bf16.mxu1 %v2375_v58  ;;  %v1105_v50 = vrot.slane %v2696_v5, 2  ;;  %v1109_v4 = vsel %vm1089_vm2, %v1106_v51, %v1108_v16 }
  0xb5   : > { %960 = vrot.lane.b32.xlu1 %v2809_v30, %s2580_s10  ;;  %833 = vrot.lane.b32.xlu0 %v621_v36, %s2579_s9  ;;  %v1098_v36 = vrot.slane %v3000_v62, 2 }
  0xb6   : > { %2378 = vmatpush3.bf16.msra.mxu0 %v2375_v58  ;;  %2386 = vmatpush3.bf16.msra.mxu1 %v2375_v58 }
  0xb7   : > { %v374_v52 = vpop.permute.xlu1 %373  ;;  %v372_v55 = vpop.permute.xlu0 %371  ;;  %v1099_v42 = vsel %vm1089_vm2, %v1096_v45, %v1098_v36  ;;  %v1103_v45 = vrot.slane %v3011_v23, 2 }
  0xb8   : > { %449 = vst.msk [vmem:[#allocation2 + $0xa8] sm:$0xff] %vm427_vm3, %v374_v52  ;;  %448 = vst.msk [vmem:[#allocation2 + $0xa0] sm:$0xff] %vm427_vm3, %v372_v55  ;;  %v1107_v55 = vsel %vm1089_vm2, %v1105_v50, %v1106_v51  ;;  %v232_v50 = vld [vmem:[%s2668_s5 + $0xa0] sm:$0x3] }
  0xb9   : > { %1180 = vrot.lane.b32.xlu1 %v2879_v43, %s2581_s22  ;;  %962 = vrot.lane.b32.xlu0 %v3035_v8, %s2580_s10  ;;  %v1602_v43 = vld [vmem:[%s4120_s1 + $0x18] sm:$0xff] }
  0xba   : > { %v2379_v37 = vpack.c.bf16 %v1602_v43, %v1601_v0 }
  0xbb   : > { %v378_v59 = vpop.permute.xlu1 %377  ;;  %v376_v60 = vpop.permute.xlu0 %375 }
  0xbc   : > { %451 = vst.msk [vmem:[#allocation2 + $0xb8] sm:$0xff] %vm427_vm3, %v378_v59  ;;  %450 = vst.msk [vmem:[#allocation2 + $0xb0] sm:$0xff] %vm427_vm3, %v376_v60  ;;  %2380 = vmatprep.subr.bf16.mxu0 %v2379_v37  ;;  %2384 = vmatprep.subr.bf16.mxu1 %v2379_v37  ;;  %v1110_v59 = vrot.slane %v2702_v7, 2  ;;  %v1111_v60 = vrot.slane %v2699_v6, 2 }
  0xbd   : > { %1309 = vrot.lane.b32.xlu1 %v2890_v46, %s2582_s30  ;;  %1182 = vrot.lane.b32.xlu0 %v1094_v56, %s2581_s22 }
  0xbe   : > { %2382 = vmatpush3.bf16.msra.mxu0 %v2379_v37  ;;  %2387 = vmatpush3.bf16.msra.mxu1 %v2379_v37  ;;  %v3195_v43 = vsel %vm1089_vm2, %v1110_v59, %v1111_v60  ;;  %v1113_v37 = vrot.slane %v3039_v53, 2  ;;  %v647_v59 = vrot.slane %v2732_v15, 1 }
  0xbf   : > { %v382_v62 = vpop.permute.xlu1 %381  ;;  %v380_v9 = vpop.permute.xlu0 %379  ;;  %2325 = vmatprep.subr.msk.mxu0 %vm1701_vm4, %v1603_v3  ;;  %2385 = vmatprep.subr.msk.mxu1 %vm1701_vm4, %v1603_v3 }
  0xc0   : > { %453 = vst.msk [vmem:[#allocation2 + $0xc8] sm:$0xff] %vm427_vm3, %v382_v62  ;;  %452 = vst.msk [vmem:[#allocation2 + $0xc0] sm:$0xff] %vm427_vm3, %v380_v9  ;;  %v229_v62 = vld [vmem:[%s2668_s5 + $0x88] sm:$0x3]  ;;  %v1114_v6 = vsel %vm1089_vm2, %v1111_v60, %v1113_v37  ;;  %v648_v60 = vrot.slane %v2729_v14, 1 }
  0xc1   : > { %1311 = vrot.lane.b32.xlu1 %v1099_v42, %s2582_s30  ;;  %835 = vrot.lane.b32.xlu0 %v2809_v30, %s2579_s9  ;;  %v1104_v30 = vsel %vm1089_vm2, %v1101_v48, %v1103_v45 }
  0xc2   : > { %2326 = vmatpush3.msk.msra.mxu0 %vm1701_vm4, %v1603_v3  ;;  %2388 = vmatpush3.msk.msra.mxu1 %vm1701_vm4, %v1603_v3 }
  0xc3   : > { %v386_v38 = vpop.permute.xlu1 %385  ;;  %v384_v41 = vpop.permute.xlu0 %383 }
  0xc4   : > { %455 = vst.msk [vmem:[#allocation2 + $0xd8] sm:$0xff] %vm427_vm3, %v386_v38  ;;  %454 = vst.msk [vmem:[#allocation2 + $0xd0] sm:$0xff] %vm427_vm3, %v384_v41 }
  0xc5   : > { %837 = vrot.lane.b32.xlu1 %v3035_v8, %s2579_s9  ;;  %1438 = vrot.lane.b32.xlu0 %v2905_v49, %s2583_s11 }
  0xc7   : > { %v390_v23 = vpop.permute.xlu1 %389  ;;  %v388_v40 = vpop.permute.xlu0 %387 }
  0xc8   : > { %457 = vst.msk [vmem:[#allocation2 + $0xe8] sm:$0xff] %vm427_vm3, %v390_v23  ;;  %456 = vst.msk [vmem:[#allocation2 + $0xe0] sm:$0xff] %vm427_vm3, %v388_v40 }
  0xc9   : > { %1440 = vrot.lane.b32.xlu1 %v1104_v30, %s2583_s11  ;;  %964 = vrot.lane.b32.xlu0 %v3048_v54, %s2580_s10 }
  0xcb   : > { %v394_v8 = vpop.permute.xlu1 %393  ;;  %v392_v47 = vpop.permute.xlu0 %391 }
  0xcc   : > { %459 = vst.msk [vmem:[#allocation2 + $0xf8] sm:$0xff] %vm427_vm3, %v394_v8  ;;  %458 = vst.msk [vmem:[#allocation2 + $0xf0] sm:$0xff] %vm427_vm3, %v392_v47  ;;  %v1118_v47 = vrot.slane %v229_v62, 2 }
  0xcd   : > { %1184 = vrot.lane.b32.xlu1 %v2890_v46, %s2581_s22  ;;  %966 = vrot.lane.b32.xlu0 %v3051_v22, %s2580_s10 }
  0xcf   : > { %v465_v2 = vpop.permute.xlu1 %464  ;;  %v463_v48 = vpop.permute.xlu0 %462 }
  0xd0   : > { %560 = vst.msk [vmem:[#allocation2 + $0x8] sm:$0xff] %vm558_vm5, %v465_v2  ;;  %559 = vst.msk [vmem:[#allocation2] sm:$0xff] %vm558_vm5, %v463_v48  ;;  %v642_v2 = vrot.slane %v2726_v13, 1 }
  0xd1   : > { %1313 = vrot.lane.b32.xlu1 %v2905_v49, %s2582_s30  ;;  %1186 = vrot.lane.b32.xlu0 %v1099_v42, %s2581_s22 }
  0xd3   : > { %v469_v46 = vpop.permute.xlu1 %468  ;;  %v467_v52 = vpop.permute.xlu0 %466 }
  0xd4   : > { %562 = vst.msk [vmem:[#allocation2 + $0x18] sm:$0xff] %vm558_vm5, %v469_v46  ;;  %561 = vst.msk [vmem:[#allocation2 + $0x10] sm:$0xff] %vm558_vm5, %v467_v52  ;;  %v645_v46 = vrot.slane %v232_v50, 1 }
  0xd5   : > { %1315 = vrot.lane.b32.xlu1 %v1104_v30, %s2582_s30  ;;  %839 = vrot.lane.b32.xlu0 %v3048_v54, %s2579_s9 }
  0xd7   : > { %v473_v57 = vpop.permute.xlu1 %472  ;;  %v471_v58 = vpop.permute.xlu0 %470 }
  0xd8   : > { %564 = vst.msk [vmem:[#allocation2 + $0x28] sm:$0xff] %vm558_vm5, %v473_v57  ;;  %563 = vst.msk [vmem:[#allocation2 + $0x20] sm:$0xff] %vm558_vm5, %v471_v58 }
  0xd9   : > { %841 = vrot.lane.b32.xlu1 %v3051_v22, %s2579_s9  ;;  %1442 = vrot.lane.b32.xlu0 %v1107_v55, %s2583_s11 }
  0xdb   : > { %v477_v5 = vpop.permute.xlu1 %476  ;;  %v475_v56 = vpop.permute.xlu0 %474 }
  0xdc   : > { %566 = vst.msk [vmem:[#allocation2 + $0x38] sm:$0xff] %vm558_vm5, %v477_v5  ;;  %565 = vst.msk [vmem:[#allocation2 + $0x30] sm:$0xff] %vm558_vm5, %v475_v56  ;;  %v1120_v56 = vrot.slane %v2726_v13, 2 }
  0xdd   : > { %1444 = vrot.lane.b32.xlu1 %v1109_v4, %s2583_s11  ;;  %968 = vrot.lane.b32.xlu0 %v3066_v63, %s2580_s10 }
  0xdf   : > { %v481_v44 = vpop.permute.xlu1 %480  ;;  %v479_v54 = vpop.permute.xlu0 %478 }
  0xe0   : > { %568 = vst.msk [vmem:[#allocation2 + $0x48] sm:$0xff] %vm558_vm5, %v481_v44  ;;  %567 = vst.msk [vmem:[#allocation2 + $0x40] sm:$0xff] %vm558_vm5, %v479_v54  ;;  %v1121_v44 = vrot.slane %v2717_v12, 2 }
  0xe1   : > { %1188 = vrot.lane.b32.xlu1 %v2905_v49, %s2581_s22  ;;  %970 = vrot.lane.b32.xlu0 %v3063_v61, %s2580_s10 }
  0xe3   : > { %v485_v22 = vpop.permute.xlu1 %484  ;;  %v483_v36 = vpop.permute.xlu0 %482 }
  0xe4   : > { %570 = vst.msk [vmem:[#allocation2 + $0x58] sm:$0xff] %vm558_vm5, %v485_v22  ;;  %569 = vst.msk [vmem:[#allocation2 + $0x50] sm:$0xff] %vm558_vm5, %v483_v36  ;;  %v3271_v36 = vsel %vm1089_vm2, %v1120_v56, %v1121_v44 }
  0xe5   : > { %1317 = vrot.lane.b32.xlu1 %v1107_v55, %s2582_s30  ;;  %1190 = vrot.lane.b32.xlu0 %v1104_v30, %s2581_s22  ;;  %v1116_v30 = vrot.slane %v2711_v10, 2 }
  0xe7   : > { %v489_v0 = vpop.permute.xlu1 %488  ;;  %v487_v49 = vpop.permute.xlu0 %486 }
  0xe8   : > { %572 = vst.msk [vmem:[#allocation2 + $0x68] sm:$0xff] %vm558_vm5, %v489_v0  ;;  %571 = vst.msk [vmem:[#allocation2 + $0x60] sm:$0xff] %vm558_vm5, %v487_v49  ;;  %v3285_v49 = vsel %vm611_vm1, %v647_v59, %v648_v60 }
  0xe9   : > { %1319 = vrot.lane.b32.xlu1 %v1109_v4, %s2582_s30  ;;  %843 = vrot.lane.b32.xlu0 %v3066_v63, %s2579_s9  ;;  %v640_v63 = vrot.slane %v229_v62, 1 }
  0xeb   : > { %v493_v42 = vpop.permute.xlu1 %492  ;;  %v491_v7 = vpop.permute.xlu0 %490  ;;  %v641_v53 = vsel %vm611_vm1, %v638_v1, %v640_v63  ;;  %v1115_v1 = vrot.slane %v2714_v11, 2  ;;  %v643_v11 = vrot.slane %v2717_v12, 1  ;;  %v3276_v12 = vld [vmem:[%s2668_s5 + $0xb8] sm:$0x3] }
  0xec   : > { %574 = vst.msk [vmem:[#allocation2 + $0x78] sm:$0xff] %vm558_vm5, %v493_v42  ;;  %573 = vst.msk [vmem:[#allocation2 + $0x70] sm:$0xff] %vm558_vm5, %v491_v7  ;;  %v650_v37 = vrot.slane %v3276_v12, 1 }
  0xed   : > { %845 = vrot.lane.b32.xlu1 %v3063_v61, %s2579_s9  ;;  %1446 = vrot.lane.b32.xlu0 %v3195_v43, %s2583_s11  ;;  %v3231_v8 = vsel %vm1089_vm2, %v1115_v1, %v1116_v30  ;;  %v644_v51 = vsel %vm611_vm1, %v642_v2, %v643_v11  ;;  %v3251_v16 = vsel %vm611_vm1, %v643_v11, %v645_v46  ;;  %v1128_v11 = vrot.slane %v3276_v12, 2 }
  0xef   : > { %v497_v9 = vpop.permute.xlu1 %496  ;;  %v495_v3 = vpop.permute.xlu0 %494 }
  0xf0   : > { %576 = vst.msk [vmem:[#allocation2 + $0x88] sm:$0xff] %vm558_vm5, %v497_v9  ;;  %575 = vst.msk [vmem:[#allocation2 + $0x80] sm:$0xff] %vm558_vm5, %v495_v3 }
  0xf1   : > { %1448 = vrot.lane.b32.xlu1 %v1114_v6, %s2583_s11  ;;  %972 = vrot.lane.b32.xlu0 %v3079_v39, %s2580_s10 }
  0xf3   : > { %v501_v61 = vpop.permute.xlu1 %500  ;;  %v499_v45 = vpop.permute.xlu0 %498 }
  0xf4   : > { %578 = vst.msk [vmem:[#allocation2 + $0x98] sm:$0xff] %vm558_vm5, %v501_v61  ;;  %577 = vst.msk [vmem:[#allocation2 + $0x90] sm:$0xff] %vm558_vm5, %v499_v45 }
  0xf5   : > { %1192 = vrot.lane.b32.xlu1 %v1107_v55, %s2581_s22  ;;  %974 = vrot.lane.b32.xlu0 %v641_v53, %s2580_s10 }
  0xf7   : > { %v505_v38 = vpop.permute.xlu1 %504  ;;  %v503_v41 = vpop.permute.xlu0 %502 }
  0xf8   : > { %580 = vst.msk [vmem:[#allocation2 + $0xa8] sm:$0xff] %vm558_vm5, %v505_v38  ;;  %579 = vst.msk [vmem:[#allocation2 + $0xa0] sm:$0xff] %vm558_vm5, %v503_v41  ;;  %v1125_v38 = vrot.slane %v2732_v15, 2  ;;  %v1126_v41 = vrot.slane %v2729_v14, 2  ;;  %v652_v15 = vrot.slane %v2753_v18, 1  ;;  %v653_v14 = vrot.slane %v2750_v17, 1 }
  0xf9   : > { %1321 = vrot.lane.b32.xlu1 %v3195_v43, %s2582_s30  ;;  %1194 = vrot.lane.b32.xlu0 %v1109_v4, %s2581_s22 }
  0xfa   : > { %v3340_v2 = vsel %vm611_vm1, %v652_v15, %v653_v14 }
  0xfb   : > { %v509_v23 = vpop.permute.xlu1 %508  ;;  %v507_v40 = vpop.permute.xlu0 %506 }
  0xfc   : > { %582 = vst.msk [vmem:[#allocation2 + $0xb8] sm:$0xff] %vm558_vm5, %v509_v23  ;;  %581 = vst.msk [vmem:[#allocation2 + $0xb0] sm:$0xff] %vm558_vm5, %v507_v40  ;;  %v3326_v23 = vsel %vm1089_vm2, %v1125_v38, %v1126_v41  ;;  %v1136_v38 = vrot.slane %v2762_v19, 2 }
  0xfd   : > { %1323 = vrot.lane.b32.xlu1 %v1114_v6, %s2582_s30  ;;  %847 = vrot.lane.b32.xlu0 %v3079_v39, %s2579_s9  ;;  %v3242_v39 = vsel %vm1089_vm2, %v1116_v30, %v1118_v47  ;;  %v3331_v47 = vld [vmem:[%s2668_s5 + $0xd0] sm:$0x3] }
  0xfe   : > { %v1133_v12 = vrot.slane %v3331_v47, 2 }
  0xff   : > { %v513_v10 = vpop.permute.xlu1 %512  ;;  %v511_v48 = vpop.permute.xlu0 %510 }
 0x100   : > { %584 = vst.msk [vmem:[#allocation2 + $0xc8] sm:$0xff] %vm558_vm5, %v513_v10  ;;  %583 = vst.msk [vmem:[#allocation2 + $0xc0] sm:$0xff] %vm558_vm5, %v511_v48  ;;  %v655_v10 = vrot.slane %v3331_v47, 1 }
 0x101   : > { %849 = vrot.lane.b32.xlu1 %v641_v53, %s2579_s9  ;;  %1450 = vrot.lane.b32.xlu0 %v3231_v8, %s2583_s11 }
 0x103   : > { %v517_v52 = vpop.permute.xlu1 %516  ;;  %v515_v55 = vpop.permute.xlu0 %514 }
 0x104   : > { %586 = vst.msk [vmem:[#allocation2 + $0xd8] sm:$0xff] %vm558_vm5, %v517_v52  ;;  %585 = vst.msk [vmem:[#allocation2 + $0xd0] sm:$0xff] %vm558_vm5, %v515_v55 }
 0x105   : > { %1452 = vrot.lane.b32.xlu1 %v3242_v39, %s2583_s11  ;;  %976 = vrot.lane.b32.xlu0 %v644_v51, %s2580_s10 }
 0x107   : > { %v521_v57 = vpop.permute.xlu1 %520  ;;  %v519_v58 = vpop.permute.xlu0 %518 }
 0x108   : > { %588 = vst.msk [vmem:[#allocation2 + $0xe8] sm:$0xff] %vm558_vm5, %v521_v57  ;;  %587 = vst.msk [vmem:[#allocation2 + $0xe0] sm:$0xff] %vm558_vm5, %v519_v58 }
 0x109   : > { %978 = vrot.lane.b32.xlu0 %v3251_v16, %s2580_s10  ;;  %1196 = vrot.lane.b32.xlu1 %v3195_v43, %s2581_s22  ;;  %v1123_v43 = vrot.slane %v232_v50, 2 }
 0x10b   : > { %v525_v4 = vpop.permute.xlu1 %524  ;;  %v523_v5 = vpop.permute.xlu0 %522  ;;  %v3295_v62 = vsel %vm1089_vm2, %v1121_v44, %v1123_v43 }
 0x10c   : > { %590 = vst.msk [vmem:[#allocation2 + $0xf8] sm:$0xff] %vm558_vm5, %v525_v4  ;;  %589 = vst.msk [vmem:[#allocation2 + $0xf0] sm:$0xff] %vm558_vm5, %v523_v5  ;;  %v1130_v4 = vrot.slane %v2753_v18, 2  ;;  %v1131_v5 = vrot.slane %v2750_v17, 2  ;;  %v657_v17 = vrot.slane %v2765_v20, 1 }
 0x10d   : > { %1198 = vrot.lane.b32.xlu0 %v1114_v6, %s2581_s22  ;;  %1325 = vrot.lane.b32.xlu1 %v3231_v8, %s2582_s30  ;;  %v3298_v6 = vsel %vm611_vm1, %v648_v60, %v650_v37 }
 0x10e   : > { %v3384_v18 = vsel %vm1089_vm2, %v1130_v4, %v1131_v5  ;;  %v1140_v4 = vrot.slane %v2777_v24, 2 }
 0x10f   : > { %v705_v54 = vpop.permute.xlu1 %704  ;;  %v703_v22 = vpop.permute.xlu0 %702 }
 0x110   : > { %800 = vst.msk [vmem:[#allocation2 + $0x8] sm:$0xff] %vm798_vm6, %v705_v54  ;;  %799 = vst.msk [vmem:[#allocation2] sm:$0xff] %vm798_vm6, %v703_v22  ;;  %v658_v22 = vrot.slane %v2762_v19, 1  ;;  %v662_v19 = vrot.slane %v2777_v24, 1  ;;  %v668_v24 = vrot.slane %v2780_v25, 1 }
 0x111   : > { %724 = vrot.lane.b32.xlu0 %v641_v53, %s2578_s8  ;;  %851 = vrot.lane.b32.xlu1 %v644_v51, %s2579_s9 }
 0x113   : > { %v709_v13 = vpop.permute.xlu1 %708  ;;  %v707_v0 = vpop.permute.xlu0 %706 }
 0x114   : > { %802 = vst.msk [vmem:[#allocation2 + $0x18] sm:$0xff] %vm798_vm6, %v709_v13  ;;  %801 = vst.msk [vmem:[#allocation2 + $0x10] sm:$0xff] %vm798_vm6, %v707_v0  ;;  %v3389_v13 = vld [vmem:[%s2668_s5 + $0xe8] sm:$0x3]  ;;  %v3399_v0 = vsel %vm611_vm1, %v657_v17, %v658_v22 }
 0x115   : > { %1327 = vrot.lane.b32.xlu0 %v3242_v39, %s2582_s30  ;;  %1454 = vrot.lane.b32.xlu1 %v3271_v36, %s2583_s11  ;;  %v1138_v47 = vrot.slane %v3389_v13, 2 }
 0x117   : > { %v713_v42 = vpop.permute.xlu1 %712  ;;  %v711_v7 = vpop.permute.xlu0 %710 }
 0x118   : > { %804 = vst.msk [vmem:[#allocation2 + $0x28] sm:$0xff] %vm798_vm6, %v713_v42  ;;  %803 = vst.msk [vmem:[#allocation2 + $0x20] sm:$0xff] %vm798_vm6, %v711_v7  ;;  %v3410_v42 = vsel %vm1089_vm2, %v1131_v5, %v1133_v12  ;;  %v1141_v5 = vrot.slane %v2768_v21, 2 }
 0x119   : > { %853 = vrot.lane.b32.xlu0 %v3251_v16, %s2579_s9  ;;  %980 = vrot.lane.b32.xlu1 %v3285_v49, %s2580_s10 }
 0x11b   : > { %v717_v63 = vpop.permute.xlu1 %716  ;;  %v715_v9 = vpop.permute.xlu0 %714 }
 0x11c   : > { %806 = vst.msk [vmem:[#allocation2 + $0x38] sm:$0xff] %vm798_vm6, %v717_v63  ;;  %805 = vst.msk [vmem:[#allocation2 + $0x30] sm:$0xff] %vm798_vm6, %v715_v9 }
 0x11d   : > { %1456 = vrot.lane.b32.xlu0 %v3295_v62, %s2583_s11  ;;  %982 = vrot.lane.b32.xlu1 %v3298_v6, %s2580_s10 }
 0x11f   : > { %v721_v3 = vpop.permute.xlu1 %720  ;;  %v719_v53 = vpop.permute.xlu0 %718 }
 0x120   : > { %808 = vst.msk [vmem:[#allocation2 + $0x48] sm:$0xff] %vm798_vm6, %v721_v3  ;;  %807 = vst.msk [vmem:[#allocation2 + $0x40] sm:$0xff] %vm798_vm6, %v719_v53 }
 0x121   : > { %1200 = vrot.lane.b32.xlu0 %v3231_v8, %s2581_s22  ;;  %726 = vrot.lane.b32.xlu1 %v644_v51, %s2578_s8  ;;  %v3354_v51 = vsel %vm611_vm1, %v653_v14, %v655_v10 }
 0x123   : > { %v832_v61 = vpop.permute.xlu1 %831  ;;  %v723_v45 = vpop.permute.xlu0 %722 }
 0x124   : > { %928 = vst.msk [vmem:[#allocation2] sm:$0xff] %vm927_vm7, %v832_v61 }
 0x125   : > { %809 = vst.msk [vmem:[#allocation2 + $0x50] sm:$0xff] %vm798_vm6, %v723_v45  ;;  %1202 = vrot.lane.b32.xlu0 %v3242_v39, %s2581_s22  ;;  %1329 = vrot.lane.b32.xlu1 %v3271_v36, %s2582_s30  ;;  %v3351_v39 = vsel %vm1089_vm2, %v1126_v41, %v1128_v11  ;;  %v1135_v45 = vrot.slane %v2765_v20, 2  ;;  %v663_v20 = vrot.slane %v2768_v21, 1 }
 0x127   : > { %v961_v1 = vpop.permute.xlu1 %960  ;;  %v834_v30 = vpop.permute.xlu0 %833 }
 0x128   : > { %1057 = vst.msk [vmem:[#allocation2] sm:$0xff] %vm1056_vm8, %v961_v1 }
 0x129   : > { %929 = vst.msk [vmem:[#allocation2 + $0x8] sm:$0xff] %vm927_vm7, %v834_v30  ;;  %728 = vrot.lane.b32.xlu0 %v3251_v16, %s2578_s8  ;;  %855 = vrot.lane.b32.xlu1 %v3285_v49, %s2579_s9 }
 0x12b   : > { %v1181_v40 = vpop.permute.xlu1 %1180  ;;  %v963_v8 = vpop.permute.xlu0 %962 }
 0x12c   : > { %1277 = vst.msk [vmem:[#allocation2] sm:$0xff] %vm1276_vm9, %v1181_v40  ;;  %v3449_v40 = vld [vmem:[%s2668_s5 + $0x100] sm:$0x3] }
 0x12d   : > { %1058 = vst.msk [vmem:[#allocation2 + $0x8] sm:$0xff] %vm1056_vm8, %v963_v8  ;;  %1331 = vrot.lane.b32.xlu0 %v3295_v62, %s2582_s30  ;;  %1458 = vrot.lane.b32.xlu1 %v3326_v23, %s2583_s11  ;;  %v3458_v8 = vsel %vm611_vm1, %v662_v19, %v663_v20 }
 0x12f   : > { %v1310_v48 = vpop.permute.xlu1 %1309  ;;  %v1183_v50 = vpop.permute.xlu0 %1182 }
 0x130   : > { %1406 = vst.msk [vmem:[#allocation2] sm:$0xff] %vm1405_vm10, %v1310_v48  ;;  %v3469_v48 = vsel %vm1089_vm2, %v1136_v38, %v1138_v47 }
 0x131   : > { %1278 = vst.msk [vmem:[#allocation2 + $0x8] sm:$0xff] %vm1276_vm9, %v1183_v50  ;;  %857 = vrot.lane.b32.xlu0 %v3298_v6, %s2579_s9  ;;  %984 = vrot.lane.b32.xlu1 %v3340_v2, %s2580_s10 }
 0x133   : > { %v1312_v46 = vpop.permute.xlu1 %1311  ;;  %v836_v52 = vpop.permute.xlu0 %835 }
 0x134   : > { %1407 = vst.msk [vmem:[#allocation2 + $0x8] sm:$0xff] %vm1405_vm10, %v1312_v46 }
 0x135   : > { %930 = vst.msk [vmem:[#allocation2 + $0x10] sm:$0xff] %vm927_vm7, %v836_v52  ;;  %1460 = vrot.lane.b32.xlu0 %v3351_v39, %s2583_s11  ;;  %986 = vrot.lane.b32.xlu1 %v3354_v51, %s2580_s10 }
 0x137   : > { %v838_v55 = vpop.permute.xlu1 %837  ;;  %v1439_v16 = vpop.permute.xlu0 %1438 }
 0x138   : > { %931 = vst.msk [vmem:[#allocation2 + $0x18] sm:$0xff] %vm927_vm7, %v838_v55 }
 0x139   : > { %1535 = vst.msk [vmem:[#allocation2] sm:$0xff] %vm1534_vm11, %v1439_v16  ;;  %1204 = vrot.lane.b32.xlu0 %v3271_v36, %s2581_s22  ;;  %730 = vrot.lane.b32.xlu1 %v3285_v49, %s2578_s8  ;;  %v660_v49 = vrot.slane %v3389_v13, 1 }
 0x13b   : > { %v1441_v57 = vpop.permute.xlu1 %1440  ;;  %v965_v58 = vpop.permute.xlu0 %964  ;;  %v3413_v7 = vsel %vm611_vm1, %v658_v22, %v660_v49  ;;  %v3508_v22 = vld [vmem:[%s2668_s5 + $0x118] sm:$0x3] }
 0x13c   : > { %1536 = vst.msk [vmem:[#allocation2 + $0x8] sm:$0xff] %vm1534_vm11, %v1441_v57  ;;  %v1148_v19 = vrot.slane %v3508_v22, 2 }
 0x13d   : > { %1059 = vst.msk [vmem:[#allocation2 + $0x10] sm:$0xff] %vm1056_vm8, %v965_v58  ;;  %1206 = vrot.lane.b32.xlu0 %v3295_v62, %s2581_s22  ;;  %1333 = vrot.lane.b32.xlu1 %v3326_v23, %s2582_s30 }
 0x13f   : > { %v1185_v56 = vpop.permute.xlu1 %1184  ;;  %v967_v44 = vpop.permute.xlu0 %966 }
 0x140   : > { %v1567_v54 = vld [vmem:[#allocation2] sm:$0xff]  ;;  %1279 = vst.msk [vmem:[#allocation2 + $0x10] sm:$0xff] %vm1276_vm9, %v1185_v56 }
 0x141   : > { %1060 = vst.msk [vmem:[#allocation2 + $0x18] sm:$0xff] %vm1056_vm8, %v967_v44  ;;  %2327 = vmatprep.mubr.msk.f32.mxu0 %vm1604_vm12, %v1567_v54  ;;  %732 = vrot.lane.b32.xlu0 %v3298_v6, %s2578_s8  ;;  %v3503_v54 = vsel %vm1089_vm2, %v1140_v4, %v1141_v5 }
 0x142   : > { %859 = vrot.lane.b32.xlu1 %v3340_v2, %s2579_s9 }
 0x143   : > { %v1314_v36 = vpop.permute.xlu1 %1313  ;;  %v1187_v59 = vpop.permute.xlu0 %1186  ;;  %v1568_v60 = vld [vmem:[#allocation2 + $0x8] sm:$0xff] }
 0x144   : > { %1408 = vst.msk [vmem:[#allocation2 + $0x10] sm:$0xff] %vm1405_vm10, %v1314_v36  ;;  %2328 = vmatmul.mubr.msk.f32.vlgmr.msra.gmra.mrb[0].mxu0 %vm1604_vm12, %v1568_v60  ;;  %v670_v60 = vrot.slane %v3508_v22, 1 }
 0x145   : > { %1280 = vst.msk [vmem:[#allocation2 + $0x18] sm:$0xff] %vm1276_vm9, %v1187_v59  ;;  %1335 = vrot.lane.b32.xlu0 %v3351_v39, %s2582_s30  ;;  %v1143_v59 = vrot.slane %v3449_v40, 2 }
 0x146   : > { %1462 = vrot.lane.b32.xlu1 %v3384_v18, %s2583_s11  ;;  %v3531_v49 = vsel %vm611_vm1, %v668_v24, %v670_v60 }
 0x147   : > { %v1316_v43 = vpop.permute.xlu1 %1315  ;;  %v840_v37 = vpop.permute.xlu0 %839  ;;  %v3528_v12 = vsel %vm1089_vm2, %v1141_v5, %v1143_v59  ;;  %v3626_v5 = vld [vmem:[%s2668_s5 + $0x148] sm:$0x3] }
 0x148   : > { %1409 = vst.msk [vmem:[#allocation2 + $0x18] sm:$0xff] %vm1405_vm10, %v1316_v43 }
 0x149   : > { %932 = vst.msk [vmem:[#allocation2 + $0x20] sm:$0xff] %vm927_vm7, %v840_v37  ;;  %861 = vrot.lane.b32.xlu0 %v3354_v51, %s2579_s9 }
 0x14a   : > { %988 = vrot.lane.b32.xlu1 %v3399_v0, %s2580_s10 }
 0x14b   : > { %v842_v62 = vpop.permute.xlu1 %841  ;;  %v1443_v6 = vpop.permute.xlu0 %1442 }
 0x14c   : > { %933 = vst.msk [vmem:[#allocation2 + $0x28] sm:$0xff] %vm927_vm7, %v842_v62 }
 0x14d   : > { %1537 = vst.msk [vmem:[#allocation2 + $0x10] sm:$0xff] %vm1534_vm11, %v1443_v6  ;;  %1464 = vrot.lane.b32.xlu0 %v3410_v42, %s2583_s11 }
 0x14e   : > { %990 = vrot.lane.b32.xlu1 %v3413_v7, %s2580_s10 }
 0x14f   : > { %v1445_v63 = vpop.permute.xlu1 %1444  ;;  %v969_v9 = vpop.permute.xlu0 %968 }
 0x150   : > { %1538 = vst.msk [vmem:[#allocation2 + $0x18] sm:$0xff] %vm1534_vm11, %v1445_v63 }
 0x151   : > { %1061 = vst.msk [vmem:[#allocation2 + $0x20] sm:$0xff] %vm1056_vm8, %v969_v9  ;;  %1208 = vrot.lane.b32.xlu0 %v3326_v23, %s2581_s22  ;;  %v3444_v23 = vsel %vm1089_vm2, %v1135_v45, %v1136_v38 }
 0x152   : > { %734 = vrot.lane.b32.xlu1 %v3340_v2, %s2578_s8  ;;  %v665_v2 = vrot.slane %v3449_v40, 1 }
 0x153   : > { %v1189_v3 = vpop.permute.xlu1 %1188  ;;  %v971_v53 = vpop.permute.xlu0 %970 }
 0x154   : > { %v1569_v61 = vld [vmem:[#allocation2 + $0x10] sm:$0xff]  ;;  %1281 = vst.msk [vmem:[#allocation2 + $0x20] sm:$0xff] %vm1276_vm9, %v1189_v3  ;;  %v3472_v50 = vsel %vm611_vm1, %v663_v20, %v665_v2  ;;  %v1145_v3 = vrot.slane %v2783_v26, 2 }
 0x155   : > { %1062 = vst.msk [vmem:[#allocation2 + $0x28] sm:$0xff] %vm1056_vm8, %v971_v53  ;;  %2330 = vmatprep.mubr.msk.f32.mxu0 %vm1604_vm12, %v1569_v61  ;;  %1210 = vrot.lane.b32.xlu0 %v3351_v39, %s2581_s22  ;;  %v1146_v53 = vrot.slane %v2780_v25, 2 }
 0x156   : > { %1337 = vrot.lane.b32.xlu1 %v3384_v18, %s2582_s30 }
 0x157   : > { %v1318_v41 = vpop.permute.xlu1 %1317  ;;  %v1191_v1 = vpop.permute.xlu0 %1190  ;;  %v1570_v30 = vld [vmem:[#allocation2 + $0x18] sm:$0xff]  ;;  %v3562_v38 = vsel %vm1089_vm2, %v1145_v3, %v1146_v53 }
 0x158   : > { %1410 = vst.msk [vmem:[#allocation2 + $0x20] sm:$0xff] %vm1405_vm10, %v1318_v41  ;;  %2331 = vmatmul.mubr.msk.f32.gmra.mrb[2].mxu0 %vm1604_vm12, %v1570_v30  ;;  %v672_v41 = vrot.slane %v2795_v28, 1  ;;  %v3567_v30 = vld [vmem:[%s2668_s5 + $0x130] sm:$0x3] }
 0x159   : > { %1282 = vst.msk [vmem:[#allocation2 + $0x28] sm:$0xff] %vm1276_vm9, %v1191_v1  ;;  %736 = vrot.lane.b32.xlu0 %v3354_v51, %s2578_s8  ;;  %v675_v20 = vrot.slane %v3567_v30, 1 }
 0x15a   : > { %863 = vrot.lane.b32.xlu1 %v3399_v0, %s2579_s9 }
 0x15b   : > { %v1320_v15 = vpop.permute.xlu1 %1319  ;;  %v844_v14 = vpop.permute.xlu0 %843 }
 0x15c   : > { %1411 = vst.msk [vmem:[#allocation2 + $0x28] sm:$0xff] %vm1405_vm10, %v1320_v15 }
 0x15d   : > { %934 = vst.msk [vmem:[#allocation2 + $0x30] sm:$0xff] %vm927_vm7, %v844_v14  ;;  %1339 = vrot.lane.b32.xlu0 %v3410_v42, %s2582_s30 }
 0x15e   : > { %1466 = vrot.lane.b32.xlu1 %v3444_v23, %s2583_s11 }
 0x15f   : > { %v846_v11 = vpop.permute.xlu1 %845  ;;  %v1447_v10 = vpop.permute.xlu0 %1446 }
 0x160   : > { %935 = vst.msk [vmem:[#allocation2 + $0x38] sm:$0xff] %vm927_vm7, %v846_v11 }
 0x161   : > { %1539 = vst.msk [vmem:[#allocation2 + $0x20] sm:$0xff] %vm1534_vm11, %v1447_v10  ;;  %865 = vrot.lane.b32.xlu0 %v3413_v7, %s2579_s9 }
 0x162   : > { %992 = vrot.lane.b32.xlu1 %v3458_v8, %s2580_s10 }
 0x163   : > { %v1449_v39 = vpop.permute.xlu1 %1448  ;;  %v973_v51 = vpop.permute.xlu0 %972 }
 0x164   : > { %1540 = vst.msk [vmem:[#allocation2 + $0x28] sm:$0xff] %vm1534_vm11, %v1449_v39 }
 0x165   : > { %1063 = vst.msk [vmem:[#allocation2 + $0x30] sm:$0xff] %vm1056_vm8, %v973_v51  ;;  %1468 = vrot.lane.b32.xlu0 %v3469_v48, %s2583_s11 }
 0x166   : > { %994 = vrot.lane.b32.xlu1 %v3472_v50, %s2580_s10 }
 0x167   : > { %v1193_v46 = vpop.permute.xlu1 %1192  ;;  %v975_v52 = vpop.permute.xlu0 %974 }
 0x168   : > { %v1571_v55 = vld [vmem:[#allocation2 + $0x20] sm:$0xff]  ;;  %1283 = vst.msk [vmem:[#allocation2 + $0x30] sm:$0xff] %vm1276_vm9, %v1193_v46  ;;  %v1150_v46 = vrot.slane %v2795_v28, 2  ;;  %v678_v28 = vrot.slane %v2798_v29, 1 }
 0x169   : > { %1064 = vst.msk [vmem:[#allocation2 + $0x38] sm:$0xff] %vm1056_vm8, %v975_v52  ;;  %2333 = vmatprep.mubr.msk.f32.mxu0 %vm1604_vm12, %v1571_v55  ;;  %1212 = vrot.lane.b32.xlu0 %v3384_v18, %s2581_s22  ;;  %v667_v18 = vrot.slane %v2783_v26, 1  ;;  %v673_v26 = vrot.slane %v2792_v27, 1  ;;  %v1151_v52 = vrot.slane %v2792_v27, 2 }
 0x16a   : > { %738 = vrot.lane.b32.xlu1 %v3399_v0, %s2578_s8 }
 0x16b   : > { %v1322_v16 = vpop.permute.xlu1 %1321  ;;  %v1195_v57 = vpop.permute.xlu0 %1194  ;;  %v1572_v58 = vld [vmem:[#allocation2 + $0x28] sm:$0xff]  ;;  %v3517_v36 = vsel %vm611_vm1, %v667_v18, %v668_v24  ;;  %v3591_v47 = vsel %vm611_vm1, %v673_v26, %v675_v20 }
 0x16c   : > { %1412 = vst.msk [vmem:[#allocation2 + $0x30] sm:$0xff] %vm1405_vm10, %v1322_v16  ;;  %2334 = vmatmul.mubr.msk.f32.gmra.mrb[4].mxu0 %vm1604_vm12, %v1572_v58  ;;  %v677_v58 = vrot.slane %v2816_v31, 1 }
 0x16d   : > { %1284 = vst.msk [vmem:[#allocation2 + $0x38] sm:$0xff] %vm1276_vm9, %v1195_v57  ;;  %1214 = vrot.lane.b32.xlu0 %v3410_v42, %s2581_s22  ;;  %v3621_v57 = vsel %vm1089_vm2, %v1150_v46, %v1151_v52 }
 0x16e   : > { %1341 = vrot.lane.b32.xlu1 %v3444_v23, %s2582_s30 }
 0x16f   : > { %v1324_v56 = vpop.permute.xlu1 %1323  ;;  %v848_v44 = vpop.permute.xlu0 %847 }
 0x170   : > { %1413 = vst.msk [vmem:[#allocation2 + $0x38] sm:$0xff] %vm1405_vm10, %v1324_v56  ;;  %v3635_v56 = vsel %vm611_vm1, %v677_v58, %v678_v28 }
 0x171   : > { %936 = vst.msk [vmem:[#allocation2 + $0x40] sm:$0xff] %vm927_vm7, %v848_v44  ;;  %740 = vrot.lane.b32.xlu0 %v3413_v7, %s2578_s8  ;;  %v1153_v44 = vrot.slane %v3567_v30, 2 }
 0x172   : > { %867 = vrot.lane.b32.xlu1 %v3458_v8, %s2579_s9 }
 0x173   : > { %v850_v21 = vpop.permute.xlu1 %849  ;;  %v1451_v17 = vpop.permute.xlu0 %1450 }
 0x174   : > { %937 = vst.msk [vmem:[#allocation2 + $0x48] sm:$0xff] %vm927_vm7, %v850_v21 }
 0x175   : > { %1541 = vst.msk [vmem:[#allocation2 + $0x30] sm:$0xff] %vm1534_vm11, %v1451_v17  ;;  %1343 = vrot.lane.b32.xlu0 %v3469_v48, %s2582_s30  ;;  %v3647_v17 = vsel %vm1089_vm2, %v1151_v52, %v1153_v44 }
 0x176   : > { %1470 = vrot.lane.b32.xlu1 %v3503_v54, %s2583_s11 }
 0x177   : > { %v1453_v13 = vpop.permute.xlu1 %1452  ;;  %v977_v0 = vpop.permute.xlu0 %976 }
 0x178   : > { %1542 = vst.msk [vmem:[#allocation2 + $0x38] sm:$0xff] %vm1534_vm11, %v1453_v13 }
 0x179   : > { %1065 = vst.msk [vmem:[#allocation2 + $0x40] sm:$0xff] %vm1056_vm8, %v977_v0  ;;  %869 = vrot.lane.b32.xlu0 %v3472_v50, %s2579_s9 }
 0x17a   : > { %996 = vrot.lane.b32.xlu1 %v3517_v36, %s2580_s10 }
 0x17b   : > { %v979_v43 = vpop.permute.xlu0 %978  ;;  %v1197_v37 = vpop.permute.xlu1 %1196 }
 0x17c   : > { %v1573_v42 = vld [vmem:[#allocation2 + $0x30] sm:$0xff]  ;;  %1066 = vst.msk [vmem:[#allocation2 + $0x48] sm:$0xff] %vm1056_vm8, %v979_v43  ;;  %v1155_v43 = vrot.slane %v2816_v31, 2  ;;  %v683_v31 = vrot.slane %v2819_v32, 1 }
 0x17d   : > { %1285 = vst.msk [vmem:[#allocation2 + $0x40] sm:$0xff] %vm1276_vm9, %v1197_v37  ;;  %2336 = vmatprep.mubr.msk.f32.mxu0 %vm1604_vm12, %v1573_v42  ;;  %1472 = vrot.lane.b32.xlu0 %v3528_v12, %s2583_s11  ;;  %v1156_v37 = vrot.slane %v2798_v29, 2 }
 0x17e   : > { %998 = vrot.lane.b32.xlu1 %v3531_v49, %s2580_s10 }
 0x17f   : > { %v1199_v7 = vpop.permute.xlu0 %1198  ;;  %v1326_v62 = vpop.permute.xlu1 %1325  ;;  %v1574_v6 = vld [vmem:[#allocation2 + $0x38] sm:$0xff] }
 0x180   : > { %1286 = vst.msk [vmem:[#allocation2 + $0x48] sm:$0xff] %vm1276_vm9, %v1199_v7  ;;  %2337 = vmatmul.mubr.msk.f32.gmra.mrb[6].mxu0 %vm1604_vm12, %v1574_v6  ;;  %v682_v6 = vrot.slane %v2828_v33, 1 }
 0x181   : > { %1414 = vst.msk [vmem:[#allocation2 + $0x40] sm:$0xff] %vm1405_vm10, %v1326_v62  ;;  %1216 = vrot.lane.b32.xlu0 %v3444_v23, %s2581_s22  ;;  %v3576_v23 = vsel %vm611_vm1, %v672_v41, %v673_v26  ;;  %v3680_v62 = vsel %vm1089_vm2, %v1155_v43, %v1156_v37 }
 0x182   : > { %742 = vrot.lane.b32.xlu1 %v3458_v8, %s2578_s8  ;;  %v3588_v8 = vsel %vm1089_vm2, %v1146_v53, %v1148_v19  ;;  %v3694_v3 = vsel %vm611_vm1, %v682_v6, %v683_v31  ;;  %v1158_v53 = vrot.slane %v3626_v5, 2 }
 0x183   : > { %v725_v63 = vpop.permute.xlu0 %724  ;;  %v852_v9 = vpop.permute.xlu1 %851 }
 0x184   : > { %810 = vst.msk [vmem:[#allocation2 + $0x58] sm:$0xff] %vm798_vm6, %v725_v63  ;;  %v3706_v26 = vsel %vm1089_vm2, %v1156_v37, %v1158_v53 }
 0x185   : > { %938 = vst.msk [vmem:[#allocation2 + $0x50] sm:$0xff] %vm927_vm7, %v852_v9  ;;  %1218 = vrot.lane.b32.xlu0 %v3469_v48, %s2581_s22  ;;  %v3685_v9 = vld [vmem:[%s2668_s5 + $0x160] sm:$0x3] }
 0x186   : > { %1345 = vrot.lane.b32.xlu1 %v3503_v54, %s2582_s30 }
 0x187   : > { %v1328_v61 = vpop.permute.xlu0 %1327  ;;  %v1455_v45 = vpop.permute.xlu1 %1454 }
 0x188   : > { %1415 = vst.msk [vmem:[#allocation2 + $0x48] sm:$0xff] %vm1405_vm10, %v1328_v61  ;;  %v685_v61 = vrot.slane %v3685_v9, 1 }
 0x189   : > { %1543 = vst.msk [vmem:[#allocation2 + $0x40] sm:$0xff] %vm1534_vm11, %v1455_v45  ;;  %744 = vrot.lane.b32.xlu0 %v3472_v50, %s2578_s8 }
 0x18a   : > { %871 = vrot.lane.b32.xlu1 %v3517_v36, %s2579_s9 }
 0x18b   : > { %v854_v25 = vpop.permute.xlu0 %853  ;;  %v981_v1 = vpop.permute.xlu1 %980 }
 0x18c   : > { %939 = vst.msk [vmem:[#allocation2 + $0x58] sm:$0xff] %vm927_vm7, %v854_v25  ;;  %v3709_v25 = vsel %vm611_vm1, %v683_v31, %v685_v61 }
 0x18d   : > { %1067 = vst.msk [vmem:[#allocation2 + $0x50] sm:$0xff] %vm1056_vm8, %v981_v1  ;;  %1347 = vrot.lane.b32.xlu0 %v3528_v12, %s2582_s30 }
 0x18e   : > { %1474 = vrot.lane.b32.xlu1 %v3562_v38, %s2583_s11 }
 0x18f   : > { %v1457_v15 = vpop.permute.xlu0 %1456  ;;  %v983_v14 = vpop.permute.xlu1 %982 }
 0x190   : > { %v1575_v40 = vld [vmem:[#allocation2 + $0x40] sm:$0xff]  ;;  %1544 = vst.msk [vmem:[#allocation2 + $0x48] sm:$0xff] %vm1534_vm11, %v1457_v15 }
 0x191   : > { %1068 = vst.msk [vmem:[#allocation2 + $0x58] sm:$0xff] %vm1056_vm8, %v983_v14  ;;  %2339 = vmatprep.mubr.msk.f32.mxu0 %vm1604_vm12, %v1575_v40  ;;  %873 = vrot.lane.b32.xlu0 %v3531_v49, %s2579_s9  ;;  %v1160_v40 = vrot.slane %v2828_v33, 2  ;;  %v688_v33 = vrot.slane %v2831_v34, 1 }
 0x192   : > { %1000 = vrot.lane.b32.xlu1 %v3576_v23, %s2580_s10 }
 0x193   : > { %v1201_v2 = vpop.permute.xlu0 %1200  ;;  %v727_v11 = vpop.permute.xlu1 %726 }
 0x194   : > { %1287 = vst.msk [vmem:[#allocation2 + $0x50] sm:$0xff] %vm1276_vm9, %v1201_v2 }
 0x195   : > { %811 = vst.msk [vmem:[#allocation2 + $0x60] sm:$0xff] %vm798_vm6, %v727_v11  ;;  %1476 = vrot.lane.b32.xlu0 %v3588_v8, %s2583_s11 }
 0x196   : > { %1002 = vrot.lane.b32.xlu1 %v3591_v47, %s2580_s10 }
 0x197   : > { %v1203_v10 = vpop.permute.xlu0 %1202  ;;  %v1330_v48 = vpop.permute.xlu1 %1329  ;;  %v1576_v50 = vld [vmem:[#allocation2 + $0x48] sm:$0xff] }
 0x198   : > { %1288 = vst.msk [vmem:[#allocation2 + $0x58] sm:$0xff] %vm1276_vm9, %v1203_v10  ;;  %2340 = vmatmul.mubr.msk.f32.gmra.mrb[8].mxu0 %vm1604_vm12, %v1576_v50  ;;  %v687_v10 = vrot.slane %v2834_v35, 1  ;;  %v3744_v50 = vld [vmem:[%s2668_s5 + $0x178] sm:$0x3] }
 0x199   : > { %1416 = vst.msk [vmem:[#allocation2 + $0x50] sm:$0xff] %vm1405_vm10, %v1330_v48  ;;  %1220 = vrot.lane.b32.xlu0 %v3503_v54, %s2581_s22  ;;  %v680_v54 = vrot.slane %v3626_v5, 1  ;;  %v690_v46 = vrot.slane %v3744_v50, 1 }
 0x19a   : > { %746 = vrot.lane.b32.xlu1 %v3517_v36, %s2578_s8 }
 0x19b   : > { %v729_v39 = vpop.permute.xlu0 %728  ;;  %v856_v51 = vpop.permute.xlu1 %855  ;;  %v3650_v22 = vsel %vm611_vm1, %v678_v28, %v680_v54  ;;  %v3768_v58 = vsel %vm611_vm1, %v688_v33, %v690_v46 }
 0x19c   : > { %812 = vst.msk [vmem:[#allocation2 + $0x68] sm:$0xff] %vm798_vm6, %v729_v39  ;;  %v3753_v39 = vsel %vm611_vm1, %v687_v10, %v688_v33 }
 0x19d   : > { %940 = vst.msk [vmem:[#allocation2 + $0x60] sm:$0xff] %vm927_vm7, %v856_v51  ;;  %1222 = vrot.lane.b32.xlu0 %v3528_v12, %s2581_s22  ;;  %v1163_v51 = vrot.slane %v3685_v9, 2 }
 0x19e   : > { %1349 = vrot.lane.b32.xlu1 %v3562_v38, %s2582_s30 }
 0x19f   : > { %v1332_v55 = vpop.permute.xlu0 %1331  ;;  %v1459_v16 = vpop.permute.xlu1 %1458 }
 0x1a0   : > { %1417 = vst.msk [vmem:[#allocation2 + $0x58] sm:$0xff] %vm1405_vm10, %v1332_v55 }
 0x1a1   : > { %1545 = vst.msk [vmem:[#allocation2 + $0x50] sm:$0xff] %vm1534_vm11, %v1459_v16  ;;  %748 = vrot.lane.b32.xlu0 %v3531_v49, %s2578_s8 }
 0x1a2   : > { %875 = vrot.lane.b32.xlu1 %v3576_v23, %s2579_s9 }
 0x1a3   : > { %v858_v27 = vpop.permute.xlu0 %857  ;;  %v985_v4 = vpop.permute.xlu1 %984 }
 0x1a4   : > { %941 = vst.msk [vmem:[#allocation2 + $0x68] sm:$0xff] %vm927_vm7, %v858_v27 }
 0x1a5   : > { %1069 = vst.msk [vmem:[#allocation2 + $0x60] sm:$0xff] %vm1056_vm8, %v985_v4  ;;  %1351 = vrot.lane.b32.xlu0 %v3588_v8, %s2582_s30 }
 0x1a6   : > { %1478 = vrot.lane.b32.xlu1 %v3621_v57, %s2583_s11 }
 0x1a7   : > { %v1461_v18 = vpop.permute.xlu0 %1460  ;;  %v987_v24 = vpop.permute.xlu1 %986 }
 0x1a8   : > { %v1577_v21 = vld [vmem:[#allocation2 + $0x50] sm:$0xff]  ;;  %1546 = vst.msk [vmem:[#allocation2 + $0x58] sm:$0xff] %vm1534_vm11, %v1461_v18  ;;  %v1165_v18 = vrot.slane %v2834_v35, 2 }
 0x1a9   : > { %1070 = vst.msk [vmem:[#allocation2 + $0x68] sm:$0xff] %vm1056_vm8, %v987_v24  ;;  %2342 = vmatprep.mubr.msk.f32.mxu0 %vm1604_vm12, %v1577_v21  ;;  %877 = vrot.lane.b32.xlu0 %v3591_v47, %s2579_s9  ;;  %v1166_v24 = vrot.slane %v2831_v34, 2 }
 0x1aa   : > { %1004 = vrot.lane.b32.xlu1 %v3635_v56, %s2580_s10 }
 0x1ab   : > { %v1205_v36 = vpop.permute.xlu0 %1204  ;;  %v731_v59 = vpop.permute.xlu1 %730  ;;  %v3803_v34 = vsel %vm1089_vm2, %v1165_v18, %v1166_v24 }
 0x1ac   : > { %1289 = vst.msk [vmem:[#allocation2 + $0x60] sm:$0xff] %vm1276_vm9, %v1205_v36 }
 0x1ad   : > { %813 = vst.msk [vmem:[#allocation2 + $0x70] sm:$0xff] %vm798_vm6, %v731_v59  ;;  %1480 = vrot.lane.b32.xlu0 %v3647_v17, %s2583_s11  ;;  %v2449_v59 = vld [vmem:[%s2668_s5 + $0x180] sm:$0xff] }
 0x1ae   : > { %1006 = vrot.lane.b32.xlu1 %v3650_v22, %s2580_s10  ;;  %v692_v35 = vrot.slane %v2449_v59, 1 }
 0x1af   : > { %v1207_v60 = vpop.permute.xlu0 %1206  ;;  %v1334_v13 = vpop.permute.xlu1 %1333  ;;  %v1578_v0 = vld [vmem:[#allocation2 + $0x58] sm:$0xff] }
 0x1b0   : > { %1290 = vst.msk [vmem:[#allocation2 + $0x68] sm:$0xff] %vm1276_vm9, %v1207_v60  ;;  %2343 = vmatmul.mubr.msk.f32.gmra.mrb[10].mxu0 %vm1604_vm12, %v1578_v0  ;;  %v3806_v0 = vld [vmem:[%s2668_s5 + $0x190] sm:$0x3] }
 0x1b1   : > { %1418 = vst.msk [vmem:[#allocation2 + $0x60] sm:$0xff] %vm1405_vm10, %v1334_v13  ;;  %1224 = vrot.lane.b32.xlu0 %v3562_v38, %s2581_s22  ;;  %v695_v43 = vrot.slane %v3806_v0, 1 }
 0x1b2   : > { %750 = vrot.lane.b32.xlu1 %v3576_v23, %s2578_s8 }
 0x1b3   : > { %v733_v12 = vpop.permute.xlu0 %732 }
 0x1b4   : > { %v860_v49 = vpop.permute.xlu1 %859  ;;  %814 = vst.msk [vmem:[#allocation2 + $0x78] sm:$0xff] %vm798_vm6, %v733_v12 }
 0x1b5   : > { %942 = vst.msk [vmem:[#allocation2 + $0x70] sm:$0xff] %vm927_vm7, %v860_v49  ;;  %1226 = vrot.lane.b32.xlu0 %v3588_v8, %s2581_s22  ;;  %v1161_v8 = vrot.slane %v2819_v32, 2  ;;  %v1168_v49 = vrot.slane %v3744_v50, 2 }
 0x1b6   : > { %1353 = vrot.lane.b32.xlu1 %v3621_v57, %s2582_s30 }
 0x1b7   : > { %v1336_v42 = vpop.permute.xlu0 %1335  ;;  %v3739_v11 = vsel %vm1089_vm2, %v1160_v40, %v1161_v8 }
 0x1b8   : > { %v1463_v7 = vpop.permute.xlu1 %1462  ;;  %1419 = vst.msk [vmem:[#allocation2 + $0x68] sm:$0xff] %vm1405_vm10, %v1336_v42 }
 0x1b9   : > { %1547 = vst.msk [vmem:[#allocation2 + $0x60] sm:$0xff] %vm1534_vm11, %v1463_v7  ;;  %752 = vrot.lane.b32.xlu0 %v3591_v47, %s2578_s8 }
 0x1ba   : > { %879 = vrot.lane.b32.xlu1 %v3635_v56, %s2579_s9 }
 0x1bb   : > { %v862_v29 = vpop.permute.xlu0 %861 }
 0x1bc   : > { %v989_v63 = vpop.permute.xlu1 %988  ;;  %943 = vst.msk [vmem:[#allocation2 + $0x78] sm:$0xff] %vm927_vm7, %v862_v29 }
 0x1bd   : > { %1071 = vst.msk [vmem:[#allocation2 + $0x70] sm:$0xff] %vm1056_vm8, %v989_v63  ;;  %1355 = vrot.lane.b32.xlu0 %v3647_v17, %s2582_s30 }
 0x1be   : > { %1482 = vrot.lane.b32.xlu1 %v3680_v62, %s2583_s11 }
 0x1bf   : > { %v1465_v45 = vpop.permute.xlu0 %1464 }
 0x1c0   : > { %v991_v38 = vpop.permute.xlu1 %990  ;;  %v1579_v41 = vld [vmem:[#allocation2 + $0x60] sm:$0xff]  ;;  %1548 = vst.msk [vmem:[#allocation2 + $0x68] sm:$0xff] %vm1534_vm11, %v1465_v45 }
 0x1c1   : > { %1072 = vst.msk [vmem:[#allocation2 + $0x78] sm:$0xff] %vm1056_vm8, %v991_v38  ;;  %2345 = vmatprep.mubr.msk.f32.mxu0 %vm1604_vm12, %v1579_v41  ;;  %881 = vrot.lane.b32.xlu0 %v3650_v22, %s2579_s9  ;;  %v1170_v38 = vrot.slane %v2449_v59, 2 }
 0x1c2   : > { %1008 = vrot.lane.b32.xlu1 %v3694_v3, %s2580_s10 }
 0x1c3   : > { %v1209_v1 = vpop.permute.xlu0 %1208 }
 0x1c4   : > { %v735_v30 = vpop.permute.xlu1 %734  ;;  %1291 = vst.msk [vmem:[#allocation2 + $0x70] sm:$0xff] %vm1276_vm9, %v1209_v1 }
 0x1c5   : > { %815 = vst.msk [vmem:[#allocation2 + $0x80] sm:$0xff] %vm798_vm6, %v735_v30  ;;  %1484 = vrot.lane.b32.xlu0 %v3706_v26, %s2583_s11  ;;  %v2451_v30 = vld [vmem:[%s2668_s5 + $0x198] sm:$0xff] }
 0x1c6   : > { %1010 = vrot.lane.b32.xlu1 %v3709_v25, %s2580_s10 }
 0x1c7   : > { %v1211_v23 = vpop.permute.xlu0 %1210  ;;  %v1580_v20 = vld [vmem:[#allocation2 + $0x68] sm:$0xff] }
 0x1c8   : > { %v1338_v19 = vpop.permute.xlu1 %1337  ;;  %1292 = vst.msk [vmem:[#allocation2 + $0x78] sm:$0xff] %vm1276_vm9, %v1211_v23  ;;  %2346 = vmatmul.mubr.msk.f32.gmra.mrb[12].mxu0 %vm1604_vm12, %v1580_v20  ;;  %v697_v23 = vrot.slane %v2451_v30, 1 }
 0x1c9   : > { %1420 = vst.msk [vmem:[#allocation2 + $0x70] sm:$0xff] %vm1405_vm10, %v1338_v19  ;;  %1228 = vrot.lane.b32.xlu0 %v3621_v57, %s2581_s22  ;;  %v3765_v57 = vsel %vm1089_vm2, %v1161_v8, %v1163_v51  ;;  %v1173_v8 = vrot.slane %v3806_v0, 2 }
 0x1ca   : > { %754 = vrot.lane.b32.xlu1 %v3635_v56, %s2578_s8 }
 0x1cb   : > { %v737_v15 = vpop.permute.xlu0 %736 }
 0x1cc   : > { %v864_v14 = vpop.permute.xlu1 %863  ;;  %816 = vst.msk [vmem:[#allocation2 + $0x88] sm:$0xff] %vm798_vm6, %v737_v15 }
 0x1cd   : > { %944 = vst.msk [vmem:[#allocation2 + $0x80] sm:$0xff] %vm927_vm7, %v864_v14  ;;  %1230 = vrot.lane.b32.xlu0 %v3647_v17, %s2581_s22  ;;  %v265_v14 = vld [vmem:[%s2668_s5 + $0x1a8] sm:$0x3] }
 0x1ce   : > { %1357 = vrot.lane.b32.xlu1 %v3680_v62, %s2582_s30 }
 0x1cf   : > { %v1340_v47 = vpop.permute.xlu0 %1339 }
 0x1d0   : > { %v1467_v2 = vpop.permute.xlu1 %1466  ;;  %1421 = vst.msk [vmem:[#allocation2 + $0x78] sm:$0xff] %vm1405_vm10, %v1340_v47  ;;  %v700_v47 = vrot.slane %v265_v14, 1 }
 0x1d1   : > { %1549 = vst.msk [vmem:[#allocation2 + $0x70] sm:$0xff] %vm1534_vm11, %v1467_v2  ;;  %756 = vrot.lane.b32.xlu0 %v3650_v22, %s2578_s8  ;;  %v3798_v22 = vld [vmem:[%s2668_s5 + $0x188] sm:$0xff] }
 0x1d2   : > { %883 = vrot.lane.b32.xlu1 %v3694_v3, %s2579_s9  ;;  %v693_v36 = vrot.slane %v3798_v22, 1  ;;  %v1171_v45 = vrot.slane %v3798_v22, 2 }
 0x1d3   : > { %v866_v32 = vpop.permute.xlu0 %865 }
 0x1d4   : > { %v993_v48 = vpop.permute.xlu1 %992  ;;  %945 = vst.msk [vmem:[#allocation2 + $0x88] sm:$0xff] %vm927_vm7, %v866_v32  ;;  %v694_v12 = vsel %vm611_vm1, %v692_v35, %v693_v36  ;;  %v696_v6 = vsel %vm611_vm1, %v693_v36, %v695_v43  ;;  %v1172_v19 = vsel %vm1089_vm2, %v1170_v38, %v1171_v45  ;;  %v1174_v33 = vsel %vm1089_vm2, %v1171_v45, %v1173_v8 }
 0x1d5   : > { %1073 = vst.msk [vmem:[#allocation2 + $0x80] sm:$0xff] %vm1056_vm8, %v993_v48  ;;  %1359 = vrot.lane.b32.xlu0 %v3706_v26, %s2582_s30 }
 0x1d6   : > { %1486 = vrot.lane.b32.xlu1 %v3739_v11, %s2583_s11 }
 0x1d7   : > { %v1469_v52 = vpop.permute.xlu0 %1468 }
 0x1d8   : > { %v995_v55 = vpop.permute.xlu1 %994  ;;  %v1581_v16 = vld [vmem:[#allocation2 + $0x70] sm:$0xff]  ;;  %1550 = vst.msk [vmem:[#allocation2 + $0x78] sm:$0xff] %vm1534_vm11, %v1469_v52 }
 0x1d9   : > { %1074 = vst.msk [vmem:[#allocation2 + $0x88] sm:$0xff] %vm1056_vm8, %v995_v55  ;;  %2348 = vmatprep.mubr.msk.f32.mxu0 %vm1604_vm12, %v1581_v16  ;;  %885 = vrot.lane.b32.xlu0 %v3709_v25, %s2579_s9  ;;  %v1175_v55 = vrot.slane %v2451_v30, 2  ;;  %v1178_v16 = vrot.slane %v265_v14, 2 }
 0x1da   : > { %1012 = vrot.lane.b32.xlu1 %v3753_v39, %s2580_s10 }
 0x1db   : > { %v1213_v28 = vpop.permute.xlu0 %1212 }
 0x1dc   : > { %v739_v27 = vpop.permute.xlu1 %738  ;;  %1293 = vst.msk [vmem:[#allocation2 + $0x80] sm:$0xff] %vm1276_vm9, %v1213_v28 }
 0x1dd   : > { %817 = vst.msk [vmem:[#allocation2 + $0x90] sm:$0xff] %vm798_vm6, %v739_v27  ;;  %1488 = vrot.lane.b32.xlu0 %v3765_v57, %s2583_s11 }
 0x1de   : > { %1014 = vrot.lane.b32.xlu1 %v3768_v58, %s2580_s10 }
 0x1df   : > { %v1215_v4 = vpop.permute.xlu0 %1214  ;;  %v1582_v56 = vld [vmem:[#allocation2 + $0x78] sm:$0xff] }
 0x1e0   : > { %v1342_v5 = vpop.permute.xlu1 %1341  ;;  %1294 = vst.msk [vmem:[#allocation2 + $0x88] sm:$0xff] %vm1276_vm9, %v1215_v4  ;;  %2349 = vmatmul.mubr.msk.f32.gmra.mrb[14].mxu0 %vm1604_vm12, %v1582_v56 }
 0x1e1   : > { %1422 = vst.msk [vmem:[#allocation2 + $0x80] sm:$0xff] %vm1405_vm10, %v1342_v5  ;;  %1232 = vrot.lane.b32.xlu0 %v3680_v62, %s2581_s22  ;;  %v3824_v62 = vsel %vm1089_vm2, %v1166_v24, %v1168_v49 }
 0x1e2   : > { %758 = vrot.lane.b32.xlu1 %v3694_v3, %s2578_s8 }
 0x1e3   : > { %v741_v44 = vpop.permute.xlu0 %740 }
 0x1e4   : > { %v868_v54 = vpop.permute.xlu1 %867  ;;  %818 = vst.msk [vmem:[#allocation2 + $0x98] sm:$0xff] %vm798_vm6, %v741_v44 }
 0x1e5   : > { %946 = vst.msk [vmem:[#allocation2 + $0x90] sm:$0xff] %vm927_vm7, %v868_v54  ;;  %1234 = vrot.lane.b32.xlu0 %v3706_v26, %s2581_s22 }
 0x1e6   : > { %1361 = vrot.lane.b32.xlu1 %v3739_v11, %s2582_s30 }
 0x1e7   : > { %v1344_v21 = vpop.permute.xlu0 %1343 }
 0x1e8   : > { %v1471_v17 = vpop.permute.xlu1 %1470  ;;  %1423 = vst.msk [vmem:[#allocation2 + $0x88] sm:$0xff] %vm1405_vm10, %v1344_v21 }
 0x1e9   : > { %1551 = vst.msk [vmem:[#allocation2 + $0x80] sm:$0xff] %vm1534_vm11, %v1471_v17  ;;  %760 = vrot.lane.b32.xlu0 %v3709_v25, %s2578_s8  ;;  %v2450_v25 = vld [vmem:[%s2668_s5 + $0x1a0] sm:$0xff]  ;;  %s3874_s5 = sand.u32 1, %s2566_s16  }
 0x1ea   : > { %887 = vrot.lane.b32.xlu1 %v3753_v39, %s2579_s9  ;;  %v698_v1 = vrot.slane %v2450_v25, 1  ;;  %v1176_v52 = vrot.slane %v2450_v25, 2  ;;  %s2071_s27 = scalar_lea.sflag [#allocation4], %s3874_s5 }
 0x1eb   : > { %v870_v60 = vpop.permute.xlu0 %869 }
 0x1ec   : > { %v997_v13 = vpop.permute.xlu1 %996  ;;  %947 = vst.msk [vmem:[#allocation2 + $0x98] sm:$0xff] %vm927_vm7, %v870_v60  ;;  %v699_v40 = vsel %vm611_vm1, %v697_v23, %v698_v1  ;;  %v701_v32 = vsel %vm611_vm1, %v698_v1, %v700_v47  ;;  %v1177_v28 = vsel %vm1089_vm2, %v1175_v55, %v1176_v52  ;;  %v1179_v27 = vsel %vm1089_vm2, %v1176_v52, %v1178_v16 }
 0x1ed   : > { %1075 = vst.msk [vmem:[#allocation2 + $0x90] sm:$0xff] %vm1056_vm8, %v997_v13  ;;  %1363 = vrot.lane.b32.xlu0 %v3765_v57, %s2582_s30 }
 0x1ee   : > { %1490 = vrot.lane.b32.xlu1 %v3803_v34, %s2583_s11 }
 0x1ef   : > { %v1473_v37 = vpop.permute.xlu0 %1472 }
 0x1f0   : > { %v999_v42 = vpop.permute.xlu1 %998  ;;  %v1583_v7 = vld [vmem:[#allocation2 + $0x80] sm:$0xff]  ;;  %1552 = vst.msk [vmem:[#allocation2 + $0x88] sm:$0xff] %vm1534_vm11, %v1473_v37 }
 0x1f1   : > { %1076 = vst.msk [vmem:[#allocation2 + $0x98] sm:$0xff] %vm1056_vm8, %v999_v42  ;;  %2351 = vmatprep.mubr.msk.f32.mxu1 %vm1604_vm12, %v1583_v7  ;;  %889 = vrot.lane.b32.xlu0 %v3768_v58, %s2579_s9 }
 0x1f2   : > { %1016 = vrot.lane.b32.xlu1 %v694_v12, %s2580_s10 }
 0x1f3   : > { %v1217_v31 = vpop.permute.xlu0 %1216 }
 0x1f4   : > { %v743_v29 = vpop.permute.xlu1 %742  ;;  %1295 = vst.msk [vmem:[#allocation2 + $0x90] sm:$0xff] %vm1276_vm9, %v1217_v31 }
 0x1f5   : > { %819 = vst.msk [vmem:[#allocation2 + $0xa0] sm:$0xff] %vm798_vm6, %v743_v29  ;;  %1492 = vrot.lane.b32.xlu0 %v3824_v62, %s2583_s11 }
 0x1f6   : > { %1018 = vrot.lane.b32.xlu1 %v696_v6, %s2580_s10 }
 0x1f7   : > { %v1219_v63 = vpop.permute.xlu0 %1218  ;;  %v1584_v3 = vld [vmem:[#allocation2 + $0x88] sm:$0xff] }
 0x1f8   : > { %v1346_v9 = vpop.permute.xlu1 %1345  ;;  %1296 = vst.msk [vmem:[#allocation2 + $0x98] sm:$0xff] %vm1276_vm9, %v1219_v63  ;;  %2352 = vmatmul.mubr.msk.f32.vlgmr.msra.gmra.mrb[0].mxu1 %vm1604_vm12, %v1584_v3 }
 0x1f9   : > { %1424 = vst.msk [vmem:[#allocation2 + $0x90] sm:$0xff] %vm1405_vm10, %v1346_v9  ;;  %1236 = vrot.lane.b32.xlu0 %v3739_v11, %s2581_s22 }
 0x1fa   : > { %762 = vrot.lane.b32.xlu1 %v3753_v39, %s2578_s8 }
 0x1fb   : > { %v745_v53 = vpop.permute.xlu0 %744 }
 0x1fc   : > { %v872_v61 = vpop.permute.xlu1 %871  ;;  %820 = vst.msk [vmem:[#allocation2 + $0xa8] sm:$0xff] %vm798_vm6, %v745_v53 }
 0x1fd   : > { %948 = vst.msk [vmem:[#allocation2 + $0xa0] sm:$0xff] %vm927_vm7, %v872_v61  ;;  %1238 = vrot.lane.b32.xlu0 %v3765_v57, %s2581_s22 }
 0x1fe   : > { %1365 = vrot.lane.b32.xlu1 %v3803_v34, %s2582_s30 }
 0x1ff   : > { %v1348_v41 = vpop.permute.xlu0 %1347 }
 0x200   : > { %v1475_v26 = vpop.permute.xlu1 %1474  ;;  %1425 = vst.msk [vmem:[#allocation2 + $0x98] sm:$0xff] %vm1405_vm10, %v1348_v41 }
 0x201   : > { %1553 = vst.msk [vmem:[#allocation2 + $0x90] sm:$0xff] %vm1534_vm11, %v1475_v26  ;;  %764 = vrot.lane.b32.xlu0 %v3768_v58, %s2578_s8  ;;  %s2237_s8 = sshll.u32 %s3874_s5, 8 }
 0x202   : > { %891 = vrot.lane.b32.xlu1 %v694_v12, %s2579_s9 }
 0x203   : > { %v874_v20 = vpop.permute.xlu0 %873 }
 0x204   : > { %v1001_v15 = vpop.permute.xlu1 %1000  ;;  %949 = vst.msk [vmem:[#allocation2 + $0xa8] sm:$0xff] %vm927_vm7, %v874_v20 }
 0x205   : > { %1077 = vst.msk [vmem:[#allocation2 + $0xa0] sm:$0xff] %vm1056_vm8, %v1001_v15  ;;  %1367 = vrot.lane.b32.xlu0 %v3824_v62, %s2582_s30 }
 0x206   : > { %1494 = vrot.lane.b32.xlu1 %v1172_v19, %s2583_s11 }
 0x207   : > { %v1477_v2 = vpop.permute.xlu0 %1476 }
 0x208   : > { %v1003_v11 = vpop.permute.xlu1 %1002  ;;  %v1585_v10 = vld [vmem:[#allocation2 + $0x90] sm:$0xff]  ;;  %1554 = vst.msk [vmem:[#allocation2 + $0x98] sm:$0xff] %vm1534_vm11, %v1477_v2 }
 0x209   : > { %1078 = vst.msk [vmem:[#allocation2 + $0xa8] sm:$0xff] %vm1056_vm8, %v1003_v11  ;;  %2354 = vmatprep.mubr.msk.f32.mxu1 %vm1604_vm12, %v1585_v10  ;;  %893 = vrot.lane.b32.xlu0 %v696_v6, %s2579_s9  ;;  %s3891_s9 = scalar_lea.vmem [#allocation3], %s2237_s8 }
 0x20a   : > { %1020 = vrot.lane.b32.xlu1 %v699_v40, %s2580_s10  ;;  %s2092_s12 = sshll.u32 %s3891_s9, 4  ;;  %s4003_s12 = int_to_ptr.vmem [resolvable:$true] %s2092_s12 }
 0x20b   : > { %v1221_v48 = vpop.permute.xlu0 %1220  ;;  %s2452_s28 = scalar_lea.vmem %s4003_s12, 4096 }
 0x20c   : > { %v747_v50 = vpop.permute.xlu1 %746  ;;  %1297 = vst.msk [vmem:[#allocation2 + $0xa0] sm:$0xff] %vm1276_vm9, %v1221_v48  ;;  %p2453_p11 = scmp.ne.s32.totalorder %s4003_s12, %s2452_s28 }
 0x20d   : > { %821 = vst.msk [vmem:[#allocation2 + $0xb0] sm:$0xff] %vm798_vm6, %v747_v50  ;;  %1496 = vrot.lane.b32.xlu0 %v1174_v33, %s2583_s11 }
 0x20e   : > { %1022 = vrot.lane.b32.xlu1 %v701_v32, %s2580_s10  ;;  %s2279_s10 = sshll.u32 %s2634_s19, 12  ;;  %p2454_p12 = pnand %p2453_p11, %p2653_p5 }
 0x20f   : > { %v1223_v39 = vpop.permute.xlu0 %1222  ;;  %v1586_v46 = vld [vmem:[#allocation2 + $0x98] sm:$0xff]  ;;  %s4001_s23 = scalar_lea.hbm %s4121_s2, %s2279_s10 }
 0x210   : > { %v1350_v51 = vpop.permute.xlu1 %1349  ;;  %1298 = vst.msk [vmem:[#allocation2 + $0xa8] sm:$0xff] %vm1276_vm9, %v1223_v39  ;;  %2355 = vmatmul.mubr.msk.f32.gmra.mrb[2].mxu1 %vm1604_vm12, %v1586_v46  ;;  %p2455_p13 = pneg %p2454_p12 }
 0x211   : > { %1426 = vst.msk [vmem:[#allocation2 + $0xa0] sm:$0xff] %vm1405_vm10, %v1350_v51  ;;  %1240 = vrot.lane.b32.xlu0 %v3803_v34, %s2581_s22 }
 0x212   : > { %1242 = vrot.lane.b32.xlu1 %v3824_v62, %s2581_s22 }
 0x213   : > { %v749_v57 = vpop.permute.xlu0 %748 }
 0x214   : > { %v876_v58 = vpop.permute.xlu1 %875  ;;  %822 = vst.msk [vmem:[#allocation2 + $0xb8] sm:$0xff] %vm798_vm6, %v749_v57 }
 0x215   : > { %950 = vst.msk [vmem:[#allocation2 + $0xb0] sm:$0xff] %vm927_vm7, %v876_v58  ;;  %1369 = vrot.lane.b32.xlu0 %v1172_v19, %s2582_s30 }
 0x216   : > { %1371 = vrot.lane.b32.xlu1 %v1174_v33, %s2582_s30  ;;  %s2456_s30 = sshll.u32 %s2584_s29, 4  ;;  %s2457_s30 = int_to_ptr.vmem [resolvable:$false] %s2456_s30 }
 0x217   : > { %v1352_v4 = vpop.permute.xlu0 %1351  ;;  %v2329_v5 = vpop.f32.mrb[0].mxu0  ;;  %s2458_s6 = scalar_lea.vmem %s2457_s30, 8192  ;;  %p2459_p0 = scmp.lt.s32.totalorder %s4003_s12, %s2457_s30 }
 0x218   : > { %1427 = vst.msk [vmem:[#allocation2 + $0xa8] sm:$0xff] %vm1405_vm10, %v1352_v4  ;;  %1931 = vst [vmem:[%s3891_s9 + $0x8] sm:$0xff] %v2329_v5  ;;  %v2001_v56 = vmul.f32 %v2329_v5, %v2329_v5  ;;  %v1479_v44 = vpop.permute.xlu1 %1478  ;;  %v1771_v54 = vpop.f32.mrb[1].mxu0  ;;  %p2460_p1 = scmp.lt.s32.totalorder %s2458_s6, %s2452_s28 }
 0x219   : > { %1555 = vst.msk [vmem:[#allocation2 + $0xa0] sm:$0xff] %vm1534_vm11, %v1479_v44  ;;  %1930 = vst [vmem:[%s3891_s9] sm:$0xff] %v1771_v54  ;;  %v1962_v18 = vadd.f32 %v2329_v5, %v1771_v54  ;;  %v2000_v24 = vmul.f32 %v1771_v54, %v1771_v54  ;;  %1498 = vrot.lane.b32.xlu0 %v1177_v28, %s2583_s11 }
 0x21a   : > { %1500 = vrot.lane.b32.xlu1 %v1179_v27, %s2583_s11  ;;  %p2461_p2 = por %p2460_p1, %p2459_p0 }
 0x21b   : > { %v2032_v21 = vadd.f32 %v2001_v56, %v2000_v24  ;;  %v878_v17 = vpop.permute.xlu0 %877 }
 0x21c   : > { %951 = vst.msk [vmem:[#allocation2 + $0xb8] sm:$0xff] %vm927_vm7, %v878_v17  ;;  %v1005_v22 = vpop.permute.xlu1 %1004  ;;  %p2462_p3 = pnand %p2461_p2, %p2455_p13 }
 0x21d   : > { %1079 = vst.msk [vmem:[#allocation2 + $0xb0] sm:$0xff] %vm1056_vm8, %v1005_v22 }
 0x21f   : > { %v1481_v36 = vpop.permute.xlu0 %1480 }
 0x220   : > { %1556 = vst.msk [vmem:[#allocation2 + $0xa8] sm:$0xff] %vm1534_vm11, %v1481_v36  ;;  %v1007_v59 = vpop.permute.xlu1 %1006  ;;  %v1587_v35 = vld [vmem:[#allocation2 + $0xa0] sm:$0xff] }
 0x221   : > { %1080 = vst.msk [vmem:[#allocation2 + $0xb8] sm:$0xff] %vm1056_vm8, %v1007_v59  ;;  %2357 = vmatprep.mubr.msk.f32.mxu1 %vm1604_vm12, %v1587_v35 }
 0x223   : > { %v1225_v34 = vpop.permute.xlu0 %1224 }
 0x224   : > { %1299 = vst.msk [vmem:[#allocation2 + $0xb0] sm:$0xff] %vm1276_vm9, %v1225_v34  ;;  %v751_v60 = vpop.permute.xlu1 %750 }
 0x225   : > { %823 = vst.msk [vmem:[#allocation2 + $0xc0] sm:$0xff] %vm798_vm6, %v751_v60 }
 0x227   : > { %v1227_v13 = vpop.permute.xlu0 %1226  ;;  %v1588_v0 = vld [vmem:[#allocation2 + $0xa8] sm:$0xff] }
 0x228   : > { %1300 = vst.msk [vmem:[#allocation2 + $0xb8] sm:$0xff] %vm1276_vm9, %v1227_v13  ;;  %v1354_v12 = vpop.permute.xlu1 %1353  ;;  %2358 = vmatmul.mubr.msk.f32.gmra.mrb[4].mxu1 %vm1604_vm12, %v1588_v0 }
 0x229   : > { %1428 = vst.msk [vmem:[#allocation2 + $0xb0] sm:$0xff] %vm1405_vm10, %v1354_v12 }
 0x22b   : > { %v753_v49 = vpop.permute.xlu0 %752  ;;  %v2332_v43 = vpop.f32.mrb[2].mxu0 }
 0x22c   : > { %824 = vst.msk [vmem:[#allocation2 + $0xc8] sm:$0xff] %vm798_vm6, %v753_v49  ;;  %1933 = vst [vmem:[%s3891_s9 + $0x18] sm:$0xff] %v2332_v43  ;;  %v880_v37 = vpop.permute.xlu1 %879  ;;  %v1781_v42 = vpop.f32.mrb[3].mxu0  ;;  %v2003_v6 = vmul.f32 %v2332_v43, %v2332_v43 }
 0x22d   : > { %952 = vst.msk [vmem:[#allocation2 + $0xc0] sm:$0xff] %vm927_vm7, %v880_v37  ;;  %1932 = vst [vmem:[%s3891_s9 + $0x10] sm:$0xff] %v1781_v42  ;;  %v1963_v7 = vadd.f32 %v1962_v18, %v1781_v42  ;;  %v2002_v62 = vmul.f32 %v1781_v42, %v1781_v42 }
 0x22f   : > { %v2033_v31 = vadd.f32 %v2032_v21, %v2002_v62  ;;  %v1356_v29 = vpop.permute.xlu0 %1355  ;;  %v1964_v63 = vadd.f32 %v2332_v43, %v1963_v7 }
 0x230   : > { %1429 = vst.msk [vmem:[#allocation2 + $0xb8] sm:$0xff] %vm1405_vm10, %v1356_v29  ;;  %v1483_v9 = vpop.permute.xlu1 %1482 }
 0x231   : > { %1557 = vst.msk [vmem:[#allocation2 + $0xb0] sm:$0xff] %vm1534_vm11, %v1483_v9  ;;  %v2034_v3 = vadd.f32 %v2033_v31, %v2003_v6 }
 0x233   : > { %v882_v53 = vpop.permute.xlu0 %881 }
 0x234   : > { %953 = vst.msk [vmem:[#allocation2 + $0xc8] sm:$0xff] %vm927_vm7, %v882_v53  ;;  %v1009_v61 = vpop.permute.xlu1 %1008 }
 0x235   : > { %1081 = vst.msk [vmem:[#allocation2 + $0xc0] sm:$0xff] %vm1056_vm8, %v1009_v61 }
 0x237   : > { %v1485_v45 = vpop.permute.xlu0 %1484 }
 0x238   : > { %1558 = vst.msk [vmem:[#allocation2 + $0xb8] sm:$0xff] %vm1534_vm11, %v1485_v45  ;;  %v1011_v38 = vpop.permute.xlu1 %1010  ;;  %v1589_v41 = vld [vmem:[#allocation2 + $0xb0] sm:$0xff] }
 0x239   : > { %1082 = vst.msk [vmem:[#allocation2 + $0xc8] sm:$0xff] %vm1056_vm8, %v1011_v38  ;;  %2360 = vmatprep.mubr.msk.f32.mxu1 %vm1604_vm12, %v1589_v41 }
 0x23b   : > { %v1229_v26 = vpop.permute.xlu0 %1228 }
 0x23c   : > { %1301 = vst.msk [vmem:[#allocation2 + $0xc0] sm:$0xff] %vm1276_vm9, %v1229_v26  ;;  %v755_v25 = vpop.permute.xlu1 %754 }
 0x23d   : > { %825 = vst.msk [vmem:[#allocation2 + $0xd0] sm:$0xff] %vm798_vm6, %v755_v25 }
 0x23f   : > { %v1231_v1 = vpop.permute.xlu0 %1230  ;;  %v2335_v30 = vpop.f32.mrb[4].mxu0  ;;  %v1590_v23 = vld [vmem:[#allocation2 + $0xb8] sm:$0xff] }
 0x240   : > { %1302 = vst.msk [vmem:[#allocation2 + $0xc8] sm:$0xff] %vm1276_vm9, %v1231_v1  ;;  %1935 = vst [vmem:[%s3891_s9 + $0x28] sm:$0xff] %v2335_v30  ;;  %v1358_v19 = vpop.permute.xlu1 %1357  ;;  %v1791_v20 = vpop.f32.mrb[5].mxu0  ;;  %2361 = vmatmul.mubr.msk.f32.gmra.mrb[6].mxu1 %vm1604_vm12, %v1590_v23  ;;  %v2005_v40 = vmul.f32 %v2335_v30, %v2335_v30 }
 0x241   : > { %1430 = vst.msk [vmem:[#allocation2 + $0xc0] sm:$0xff] %vm1405_vm10, %v1358_v19  ;;  %1934 = vst [vmem:[%s3891_s9 + $0x20] sm:$0xff] %v1791_v20  ;;  %v1965_v15 = vadd.f32 %v1964_v63, %v1791_v20  ;;  %v2004_v14 = vmul.f32 %v1791_v20, %v1791_v20 }
 0x243   : > { %v2035_v8 = vadd.f32 %v2034_v3, %v2004_v14  ;;  %v757_v47 = vpop.permute.xlu0 %756  ;;  %v1966_v2 = vadd.f32 %v2335_v30, %v1965_v15 }
 0x244   : > { %826 = vst.msk [vmem:[#allocation2 + $0xd8] sm:$0xff] %vm798_vm6, %v757_v47  ;;  %v884_v11 = vpop.permute.xlu1 %883 }
 0x245   : > { %954 = vst.msk [vmem:[#allocation2 + $0xd0] sm:$0xff] %vm927_vm7, %v884_v11  ;;  %v2036_v10 = vadd.f32 %v2035_v8, %v2005_v40 }
 0x247   : > { %v1360_v33 = vpop.permute.xlu0 %1359 }
 0x248   : > { %1431 = vst.msk [vmem:[#allocation2 + $0xc8] sm:$0xff] %vm1405_vm10, %v1360_v33  ;;  %v1487_v32 = vpop.permute.xlu1 %1486 }
 0x249   : > { %1559 = vst.msk [vmem:[#allocation2 + $0xc0] sm:$0xff] %vm1534_vm11, %v1487_v32 }
 0x24b   : > { %v886_v48 = vpop.permute.xlu0 %885 }
 0x24c   : > { %955 = vst.msk [vmem:[#allocation2 + $0xd8] sm:$0xff] %vm927_vm7, %v886_v48  ;;  %v1013_v50 = vpop.permute.xlu1 %1012 }
 0x24d   : > { %1083 = vst.msk [vmem:[#allocation2 + $0xd0] sm:$0xff] %vm1056_vm8, %v1013_v50 }
 0x24f   : > { %v1489_v39 = vpop.permute.xlu0 %1488 }
 0x250   : > { %1560 = vst.msk [vmem:[#allocation2 + $0xc8] sm:$0xff] %vm1534_vm11, %v1489_v39  ;;  %v1015_v51 = vpop.permute.xlu1 %1014  ;;  %v1591_v46 = vld [vmem:[#allocation2 + $0xc0] sm:$0xff] }
 0x251   : > { %1084 = vst.msk [vmem:[#allocation2 + $0xd8] sm:$0xff] %vm1056_vm8, %v1015_v51  ;;  %2363 = vmatprep.mubr.msk.f32.mxu1 %vm1604_vm12, %v1591_v46 }
 0x253   : > { %v1233_v52 = vpop.permute.xlu0 %1232  ;;  %v2338_v55 = vpop.f32.mrb[6].mxu0 }
 0x254   : > { %1303 = vst.msk [vmem:[#allocation2 + $0xd0] sm:$0xff] %vm1276_vm9, %v1233_v52  ;;  %1937 = vst [vmem:[%s3891_s9 + $0x38] sm:$0xff] %v2338_v55  ;;  %v759_v16 = vpop.permute.xlu1 %758  ;;  %v1801_v57 = vpop.f32.mrb[7].mxu0  ;;  %v2007_v27 = vmul.f32 %v2338_v55, %v2338_v55 }
 0x255   : > { %827 = vst.msk [vmem:[#allocation2 + $0xe0] sm:$0xff] %vm798_vm6, %v759_v16  ;;  %1936 = vst [vmem:[%s3891_s9 + $0x30] sm:$0xff] %v1801_v57  ;;  %v1967_v58 = vadd.f32 %v1966_v2, %v1801_v57  ;;  %v2006_v28 = vmul.f32 %v1801_v57, %v1801_v57 }
 0x257   : > { %v2037_v4 = vadd.f32 %v2036_v10, %v2006_v28  ;;  %v1235_v5 = vpop.permute.xlu0 %1234  ;;  %v1592_v56 = vld [vmem:[#allocation2 + $0xc8] sm:$0xff]  ;;  %v1968_v44 = vadd.f32 %v2338_v55, %v1967_v58 }
 0x258   : > { %1304 = vst.msk [vmem:[#allocation2 + $0xd8] sm:$0xff] %vm1276_vm9, %v1235_v5  ;;  %v1362_v54 = vpop.permute.xlu1 %1361  ;;  %2364 = vmatmul.mubr.msk.f32.gmra.mrb[8].mxu1 %vm1604_vm12, %v1592_v56 }
 0x259   : > { %1432 = vst.msk [vmem:[#allocation2 + $0xd0] sm:$0xff] %vm1405_vm10, %v1362_v54  ;;  %v2038_v18 = vadd.f32 %v2037_v4, %v2007_v27 }
 0x25b   : > { %v761_v24 = vpop.permute.xlu0 %760 }
 0x25c   : > { %828 = vst.msk [vmem:[#allocation2 + $0xe8] sm:$0xff] %vm798_vm6, %v761_v24  ;;  %v888_v21 = vpop.permute.xlu1 %887 }
 0x25d   : > { %956 = vst.msk [vmem:[#allocation2 + $0xe0] sm:$0xff] %vm927_vm7, %v888_v21 }
 0x25f   : > { %v1364_v17 = vpop.permute.xlu0 %1363 }
 0x260   : > { %1433 = vst.msk [vmem:[#allocation2 + $0xd8] sm:$0xff] %vm1405_vm10, %v1364_v17  ;;  %v1491_v22 = vpop.permute.xlu1 %1490 }
 0x261   : > { %1561 = vst.msk [vmem:[#allocation2 + $0xd0] sm:$0xff] %vm1534_vm11, %v1491_v22 }
 0x263   : > { %v890_v36 = vpop.permute.xlu0 %889 }
 0x264   : > { %957 = vst.msk [vmem:[#allocation2 + $0xe8] sm:$0xff] %vm927_vm7, %v890_v36  ;;  %v1017_v59 = vpop.permute.xlu1 %1016 }
 0x265   : > { %1085 = vst.msk [vmem:[#allocation2 + $0xe0] sm:$0xff] %vm1056_vm8, %v1017_v59 }
 0x267   : > { %v1493_v35 = vpop.permute.xlu0 %1492 }
 0x268   : > { %1562 = vst.msk [vmem:[#allocation2 + $0xd8] sm:$0xff] %vm1534_vm11, %v1493_v35  ;;  %v1019_v34 = vpop.permute.xlu1 %1018  ;;  %v1593_v60 = vld [vmem:[#allocation2 + $0xd0] sm:$0xff] }
 0x269   : > { %1086 = vst.msk [vmem:[#allocation2 + $0xe8] sm:$0xff] %vm1056_vm8, %v1019_v34  ;;  %2366 = vmatprep.mubr.msk.f32.mxu1 %vm1604_vm12, %v1593_v60 }
 0x26b   : > { %v1237_v13 = vpop.permute.xlu0 %1236  ;;  %v2341_v0 = vpop.f32.mrb[8].mxu0 }
 0x26c   : > { %1305 = vst.msk [vmem:[#allocation2 + $0xe0] sm:$0xff] %vm1276_vm9, %v1237_v13  ;;  %1939 = vst [vmem:[%s3891_s9 + $0x48] sm:$0xff] %v2341_v0  ;;  %v763_v12 = vpop.permute.xlu1 %762  ;;  %v1811_v49 = vpop.f32.mrb[9].mxu0  ;;  %v2009_v42 = vmul.f32 %v2341_v0, %v2341_v0 }
 0x26d   : > { %829 = vst.msk [vmem:[#allocation2 + $0xf0] sm:$0xff] %vm798_vm6, %v763_v12  ;;  %1938 = vst [vmem:[%s3891_s9 + $0x40] sm:$0xff] %v1811_v49  ;;  %v1969_v43 = vadd.f32 %v1968_v44, %v1811_v49  ;;  %v2008_v37 = vmul.f32 %v1811_v49, %v1811_v49 }
 0x26f   : > { %v2039_v7 = vadd.f32 %v2038_v18, %v2008_v37  ;;  %v1239_v62 = vpop.permute.xlu0 %1238  ;;  %v1594_v6 = vld [vmem:[#allocation2 + $0xd8] sm:$0xff]  ;;  %v1970_v31 = vadd.f32 %v2341_v0, %v1969_v43 }
 0x270   : > { %1306 = vst.msk [vmem:[#allocation2 + $0xe8] sm:$0xff] %vm1276_vm9, %v1239_v62  ;;  %v1366_v29 = vpop.permute.xlu1 %1365  ;;  %2367 = vmatmul.mubr.msk.f32.gmra.mrb[10].mxu1 %vm1604_vm12, %v1594_v6 }
 0x271   : > { %1434 = vst.msk [vmem:[#allocation2 + $0xe0] sm:$0xff] %vm1405_vm10, %v1366_v29  ;;  %v2040_v63 = vadd.f32 %v2039_v7, %v2009_v42 }
 0x273   : > { %v765_v9 = vpop.permute.xlu0 %764 }
 0x274   : > { %830 = vst.msk [vmem:[#allocation2 + $0xf8] sm:$0xff] %vm798_vm6, %v765_v9  ;;  %v892_v3 = vpop.permute.xlu1 %891 }
 0x275   : > { %958 = vst.msk [vmem:[#allocation2 + $0xf0] sm:$0xff] %vm927_vm7, %v892_v3 }
 0x277   : > { %v1368_v53 = vpop.permute.xlu0 %1367 }
 0x278   : > { %1435 = vst.msk [vmem:[#allocation2 + $0xe8] sm:$0xff] %vm1405_vm10, %v1368_v53  ;;  %v1495_v61 = vpop.permute.xlu1 %1494 }
 0x279   : > { %1563 = vst.msk [vmem:[#allocation2 + $0xe0] sm:$0xff] %vm1534_vm11, %v1495_v61 }
 0x27b   : > { %v894_v45 = vpop.permute.xlu0 %893 }
 0x27c   : > { %959 = vst.msk [vmem:[#allocation2 + $0xf8] sm:$0xff] %vm927_vm7, %v894_v45  ;;  %v1021_v38 = vpop.permute.xlu1 %1020 }
 0x27d   : > { %1087 = vst.msk [vmem:[#allocation2 + $0xf0] sm:$0xff] %vm1056_vm8, %v1021_v38 }
 0x27f   : > { %v1497_v41 = vpop.permute.xlu0 %1496 }
 0x280   : > { %1564 = vst.msk [vmem:[#allocation2 + $0xe8] sm:$0xff] %vm1534_vm11, %v1497_v41  ;;  %v1023_v26 = vpop.permute.xlu1 %1022  ;;  %v1595_v25 = vld [vmem:[#allocation2 + $0xe0] sm:$0xff] }
 0x281   : > { %1088 = vst.msk [vmem:[#allocation2 + $0xf8] sm:$0xff] %vm1056_vm8, %v1023_v26  ;;  %2369 = vmatprep.mubr.msk.f32.mxu1 %vm1604_vm12, %v1595_v25 }
 0x283   : > { %v1241_v1 = vpop.permute.xlu0 %1240  ;;  %v2344_v30 = vpop.f32.mrb[10].mxu0 }
 0x284   : > { %1307 = vst.msk [vmem:[#allocation2 + $0xf0] sm:$0xff] %vm1276_vm9, %v1241_v1  ;;  %1941 = vst [vmem:[%s3891_s9 + $0x58] sm:$0xff] %v2344_v30  ;;  %v1243_v23 = vpop.permute.xlu1 %1242  ;;  %v1821_v19 = vpop.f32.mrb[11].mxu0  ;;  %v2011_v14 = vmul.f32 %v2344_v30, %v2344_v30 }
 0x285   : > { %1308 = vst.msk [vmem:[#allocation2 + $0xf8] sm:$0xff] %vm1276_vm9, %v1243_v23  ;;  %1940 = vst [vmem:[%s3891_s9 + $0x50] sm:$0xff] %v1821_v19  ;;  %v1971_v20 = vadd.f32 %v1970_v31, %v1821_v19  ;;  %v2010_v15 = vmul.f32 %v1821_v19, %v1821_v19 }
 0x287   : > { %v2041_v40 = vadd.f32 %v2040_v63, %v2010_v15  ;;  %v1370_v8 = vpop.permute.xlu0 %1369  ;;  %v1596_v47 = vld [vmem:[#allocation2 + $0xe8] sm:$0xff]  ;;  %v1972_v2 = vadd.f32 %v2344_v30, %v1971_v20 }
 0x288   : > { %1436 = vst.msk [vmem:[#allocation2 + $0xf0] sm:$0xff] %vm1405_vm10, %v1370_v8  ;;  %v1372_v11 = vpop.permute.xlu1 %1371  ;;  %2370 = vmatmul.mubr.msk.f32.gmra.mrb[12].mxu1 %vm1604_vm12, %v1596_v47 }
 0x289   : > { %1437 = vst.msk [vmem:[#allocation2 + $0xf8] sm:$0xff] %vm1405_vm10, %v1372_v11  ;;  %v2042_v10 = vadd.f32 %v2041_v40, %v2011_v14 }
 0x28b   : > { %v1499_v33 = vpop.permute.xlu0 %1498 }
 0x28c   : > { %1565 = vst.msk [vmem:[#allocation2 + $0xf0] sm:$0xff] %vm1534_vm11, %v1499_v33  ;;  %v1501_v32 = vpop.permute.xlu1 %1500 }
 0x28d   : > { %1566 = vst.msk [vmem:[#allocation2 + $0xf8] sm:$0xff] %vm1534_vm11, %v1501_v32 }
 0x293   : > { %v1597_v48 = vld [vmem:[#allocation2 + $0xf0] sm:$0xff] }
 0x294   : > { %2372 = vmatprep.mubr.msk.f32.mxu1 %vm1604_vm12, %v1597_v48  ;;  %v1598_v50 = vld [vmem:[#allocation2 + $0xf8] sm:$0xff] }
 0x295   : > { %2373 = vmatmul.mubr.msk.f32.gmra.mrb[14].mxu1 %vm1604_vm12, %v1598_v50 }
 0x29b   : > { %v2347_v39 = vpop.f32.mrb[12].mxu0 }
 0x29c   : > { %1943 = vst [vmem:[%s3891_s9 + $0x68] sm:$0xff] %v2347_v39  ;;  %v1831_v51 = vpop.f32.mrb[13].mxu0  ;;  %v2013_v55 = vmul.f32 %v2347_v39, %v2347_v39 }
 0x29d   : > { %1942 = vst [vmem:[%s3891_s9 + $0x60] sm:$0xff] %v1831_v51  ;;  %v1973_v46 = vadd.f32 %v1972_v2, %v1831_v51  ;;  %v2012_v52 = vmul.f32 %v1831_v51, %v1831_v51 }
 0x29f   : > { %v2043_v16 = vadd.f32 %v2042_v10, %v2012_v52  ;;  %v1974_v57 = vadd.f32 %v2347_v39, %v1973_v46 }
 0x2a1   : > { %v2044_v58 = vadd.f32 %v2043_v16, %v2013_v55 }
 0x2b3   : > { %v2350_v28 = vpop.f32.mrb[14].mxu0 }
 0x2b4   : > { %1945 = vst [vmem:[%s3891_s9 + $0x78] sm:$0xff] %v2350_v28  ;;  %v1841_v27 = vpop.f32.mrb[15].mxu0  ;;  %v2015_v56 = vmul.f32 %v2350_v28, %v2350_v28 }
 0x2b5   : > { %1944 = vst [vmem:[%s3891_s9 + $0x70] sm:$0xff] %v1841_v27  ;;  %v1975_v4 = vadd.f32 %v1974_v57, %v1841_v27  ;;  %v2014_v5 = vmul.f32 %v1841_v27, %v1841_v27 }
 0x2b7   : > { %v1976_v44 = vadd.f32 %v2350_v28, %v1975_v4  ;;  %v2045_v54 = vadd.f32 %v2044_v58, %v2014_v5 }
 0x2b9   : > { %v2046_v18 = vadd.f32 %v2045_v54, %v2015_v56 }
 0x2cb   : > { %v2353_v24 = vpop.f32.mrb[0].mxu1 }
 0x2cc   : > { %1947 = vst [vmem:[%s3891_s9 + $0x88] sm:$0xff] %v2353_v24  ;;  %v1851_v21 = vpop.f32.mrb[1].mxu1  ;;  %v2017_v36 = vmul.f32 %v2353_v24, %v2353_v24 }
 0x2cd   : > { %1946 = vst [vmem:[%s3891_s9 + $0x80] sm:$0xff] %v1851_v21  ;;  %v1977_v17 = vadd.f32 %v1976_v44, %v1851_v21  ;;  %v2016_v22 = vmul.f32 %v1851_v21, %v1851_v21 }
 0x2cf   : > { %v2047_v59 = vadd.f32 %v2046_v18, %v2016_v22  ;;  %v1978_v35 = vadd.f32 %v2353_v24, %v1977_v17 }
 0x2d1   : > { %v2048_v34 = vadd.f32 %v2047_v59, %v2017_v36 }
 0x2e3   : > { %v2356_v60 = vpop.f32.mrb[2].mxu1 }
 0x2e4   : > { %1949 = vst [vmem:[%s3891_s9 + $0x98] sm:$0xff] %v2356_v60  ;;  %v1861_v13 = vpop.f32.mrb[3].mxu1  ;;  %v2019_v49 = vmul.f32 %v2356_v60, %v2356_v60 }
 0x2e5   : > { %1948 = vst [vmem:[%s3891_s9 + $0x90] sm:$0xff] %v1861_v13  ;;  %v1979_v0 = vadd.f32 %v1978_v35, %v1861_v13  ;;  %v2018_v12 = vmul.f32 %v1861_v13, %v1861_v13 }
 0x2e7   : > { %v2049_v43 = vadd.f32 %v2048_v34, %v2018_v12  ;;  %v1980_v37 = vadd.f32 %v2356_v60, %v1979_v0 }
 0x2e9   : > { %v2050_v42 = vadd.f32 %v2049_v43, %v2019_v49 }
 0x2fb   : > { %v2359_v7 = vpop.f32.mrb[4].mxu1 }
 0x2fc   : > { %1951 = vst [vmem:[%s3891_s9 + $0xa8] sm:$0xff] %v2359_v7  ;;  %v1871_v62 = vpop.f32.mrb[5].mxu1  ;;  %v2021_v29 = vmul.f32 %v2359_v7, %v2359_v7 }
 0x2fd   : > { %1950 = vst [vmem:[%s3891_s9 + $0xa0] sm:$0xff] %v1871_v62  ;;  %v1981_v6 = vadd.f32 %v1980_v37, %v1871_v62  ;;  %v2020_v31 = vmul.f32 %v1871_v62, %v1871_v62 }
 0x2ff   : > { %v2051_v63 = vadd.f32 %v2050_v42, %v2020_v31  ;;  %v1982_v9 = vadd.f32 %v2359_v7, %v1981_v6 }
 0x301   : > { %v2052_v3 = vadd.f32 %v2051_v63, %v2021_v29 }
 0x313   : > { %v2362_v53 = vpop.f32.mrb[6].mxu1 }
 0x314   : > { %1953 = vst [vmem:[%s3891_s9 + $0xb8] sm:$0xff] %v2362_v53  ;;  %v1881_v61 = vpop.f32.mrb[7].mxu1  ;;  %v2023_v41 = vmul.f32 %v2362_v53, %v2362_v53 }
 0x315   : > { %1952 = vst [vmem:[%s3891_s9 + $0xb0] sm:$0xff] %v1881_v61  ;;  %v1983_v45 = vadd.f32 %v1982_v9, %v1881_v61  ;;  %v2022_v38 = vmul.f32 %v1881_v61, %v1881_v61 }
 0x317   : > { %v2053_v26 = vadd.f32 %v2052_v3, %v2022_v38  ;;  %v1984_v25 = vadd.f32 %v2362_v53, %v1983_v45 }
 0x319   : > { %v2054_v1 = vadd.f32 %v2053_v26, %v2023_v41 }
 0x32b   : > { %v2365_v30 = vpop.f32.mrb[8].mxu1 }
 0x32c   : > { %1955 = vst [vmem:[%s3891_s9 + $0xc8] sm:$0xff] %v2365_v30  ;;  %v1891_v23 = vpop.f32.mrb[9].mxu1  ;;  %v2025_v15 = vmul.f32 %v2365_v30, %v2365_v30 }
 0x32d   : > { %1954 = vst [vmem:[%s3891_s9 + $0xc0] sm:$0xff] %v1891_v23  ;;  %v1985_v19 = vadd.f32 %v1984_v25, %v1891_v23  ;;  %v2024_v20 = vmul.f32 %v1891_v23, %v1891_v23 }
 0x32f   : > { %v2055_v14 = vadd.f32 %v2054_v1, %v2024_v20  ;;  %v1986_v40 = vadd.f32 %v2365_v30, %v1985_v19 }
 0x331   : > { %v2056_v8 = vadd.f32 %v2055_v14, %v2025_v15 }
 0x343   : > { %v2368_v47 = vpop.f32.mrb[10].mxu1 }
 0x344   : > { %1957 = vst [vmem:[%s3891_s9 + $0xd8] sm:$0xff] %v2368_v47  ;;  %v1901_v2 = vpop.f32.mrb[11].mxu1  ;;  %v2027_v33 = vmul.f32 %v2368_v47, %v2368_v47 }
 0x345   : > { %1956 = vst [vmem:[%s3891_s9 + $0xd0] sm:$0xff] %v1901_v2  ;;  %v1987_v11 = vadd.f32 %v1986_v40, %v1901_v2  ;;  %v2026_v10 = vmul.f32 %v1901_v2, %v1901_v2 }
 0x347   : > { %v2057_v32 = vadd.f32 %v2056_v8, %v2026_v10  ;;  %v1988_v48 = vadd.f32 %v2368_v47, %v1987_v11 }
 0x349   : > { %v2058_v50 = vadd.f32 %v2057_v32, %v2027_v33 }
 0x35b   : > { %v2371_v39 = vpop.f32.mrb[12].mxu1 }
 0x35c   : > { %1959 = vst [vmem:[%s3891_s9 + $0xe8] sm:$0xff] %v2371_v39  ;;  %v1911_v51 = vpop.f32.mrb[13].mxu1  ;;  %v2029_v55 = vmul.f32 %v2371_v39, %v2371_v39 }
 0x35d   : > { %1958 = vst [vmem:[%s3891_s9 + $0xe0] sm:$0xff] %v1911_v51  ;;  %v1989_v46 = vadd.f32 %v1988_v48, %v1911_v51  ;;  %v2028_v52 = vmul.f32 %v1911_v51, %v1911_v51 }
 0x35f   : > { %v2059_v16 = vadd.f32 %v2058_v50, %v2028_v52  ;;  %v1990_v57 = vadd.f32 %v2371_v39, %v1989_v46 }
 0x361   : > { %v2060_v58 = vadd.f32 %v2059_v16, %v2029_v55 }
 0x368   : > { %v2374_v28 = vpop.f32.mrb[14].mxu1 }
 0x369   : > { %1961 = vst [vmem:[%s3891_s9 + $0xf8] sm:$0xff] %v2374_v28  ;;  %v1921_v27 = vpop.f32.mrb[15].mxu1 }
 0x36a   : > { %1960 = vst [vmem:[%s3891_s9 + $0xf0] sm:$0xff] %v1921_v27  ;;  %v1991_v4 = vadd.f32 %v1990_v57, %v1921_v27  ;;  %v2030_v5 = vmul.f32 %v1921_v27, %v1921_v27 }
 0x36b   : > { %2465 = shalt.err (!%p2462_p3)
}
 0x36c   : > { %s2466_s7 = scalar_lea.hbm %s4001_s23, 4096  ;;  %s2470_s9 = scalar_lea.hbm %s4121_s2, 8192 }
 0x36d   : > { %p2467_p4 = scmp.ne.s32.totalorder %s4001_s23, %s2466_s7  ;;  %p2471_p9 = scmp.lt.u32.totalorder %s4001_s23, %s4121_s2 }
 0x36e   : > { %p2472_p10 = scmp.lt.u32.totalorder %s2470_s9, %s2466_s7  ;;  %p2474_p12 = scmp.lt.u32.totalorder %s2466_s7, %s4001_s23 }
 0x36f   : > { %p2468_p7 = pnand %p2467_p4, %p2653_p5 }
 0x370   : > { %p2473_p11 = por %p2472_p10, %p2471_p9 }
 0x371   : > { %p2469_p8 = pneg %p2468_p7 }
 0x372   : > { %p2475_p13 = por %p2474_p12, %p2473_p11 }
 0x374   : > { %p2476_p0 = pnand %p2475_p13, %p2469_p8 }
 0x376   : > { %2479 = shalt.err (!%p2476_p0)
}
 0x377   : > { %s2585_s14 = smov 128   ;;  %v2031_v56 = vmul.f32 %v2374_v28, %v2374_v28  ;;  %v1992_v44 = vadd.f32 %v2374_v28, %v1991_v4  ;;  %v2061_v54 = vadd.f32 %v2060_v58, %v2030_v5  ;;  %s2075_s28 = sand.u32 1, %s2634_s19  }
 0x378   : > { %2390 = dma.vmem_to_hbm [thread:$0]  (%p2653_p5), %s4003_s12, 4096, %s4001_s23, %s2071_s27, %s2585_s14, %s2585_s14, %s2581_s22  }
 0x379   : > { %v1993_v18 = vrot.slane %v1992_v44, 4  ;;  %v2062_v24 = vadd.f32 %v2061_v54, %v2031_v56  ;;  %s2275_s29 = sshll.u32 %s2634_s19, 4  ;;  %s200_s30 = scalar_lea.vmem [#allocation5], %s3874_s5 }
 0x37a   : > { %s2108_s6 = sshll.u32 %s200_s30, 4  ;;  %s206_s22 = scalar_lea.vmem [#allocation7], %s3874_s5  ;;  %s4043_s6 = int_to_ptr.vmem [resolvable:$true] %s2108_s6 }
 0x37b   : > { %v1994_v21 = vadd.f32 %v1993_v18, %v1992_v44  ;;  %v2063_v17 = vrot.slane %v2062_v24, 4  ;;  %s2121_s12 = sshll.u32 %s206_s22, 4  ;;  %s4041_s7 = scalar_lea.hbm %s4122_s3, %s2275_s29  ;;  %s4050_s12 = int_to_ptr.vmem [resolvable:$true] %s2121_s12 }
 0x37c   : > { %s4048_s8 = scalar_lea.hbm %s4123_s4, %s2275_s29  ;;  %s4052_s9 = scalar_lea.sflag [#allocation6], %s2075_s28 }
 0x37d   : > { %v1995_v22 = vrot.slane %v1994_v21, 2  ;;  %v2064_v36 = vadd.f32 %v2063_v17, %v2062_v24  ;;  %s2480_s10 = scalar_lea.vmem %s4043_s6, 16  ;;  %s2586_s13 = smov [#allocation5]  }
 0x37e   : > { %p2481_p1 = scmp.ne.s32.totalorder %s4043_s6, %s2480_s10  ;;  %s2484_s14 = sshll.u32 %s2586_s13, 4  ;;  %s2485_s14 = int_to_ptr.vmem [resolvable:$false] %s2484_s14 }
 0x37f   : > { %v2065_v59 = vrot.slane %v2064_v36, 2  ;;  %v1996_v35 = vadd.f32 %v1995_v22, %v1994_v21  ;;  %s2486_s23 = scalar_lea.vmem %s2485_s14, 32  ;;  %p2487_p4 = scmp.lt.s32.totalorder %s4043_s6, %s2485_s14 }
 0x380   : > { %p2482_p2 = pnand %p2481_p1, %p2653_p5  ;;  %p2488_p7 = scmp.lt.s32.totalorder %s2486_s23, %s2480_s10 }
 0x381   : > { %v1997_v34 = vrot.slane %v1996_v35, 1  ;;  %v2066_v60 = vadd.f32 %v2065_v59, %v2064_v36 }
 0x382   : > { %p2483_p3 = pneg %p2482_p2  ;;  %p2489_p8 = por %p2488_p7, %p2487_p4 }
 0x383   : > { %v1998_v13 = vadd.f32 %v1997_v34, %v1996_v35  ;;  %v2067_v0 = vrot.slane %v2066_v60, 1 }
 0x384   : > { %p2490_p9 = pnand %p2489_p8, %p2483_p3 }
 0x385   : > { %1999 = vst [vmem:[%s200_s30] sm:$0x1] %v1998_v13  ;;  %v2068_v12 = vadd.f32 %v2067_v0, %v2066_v60 }
 0x386   : > { %2493 = shalt.err (!%p2490_p9)
}
 0x387   : > { %s2494_s28 = scalar_lea.hbm %s4041_s7, 16  ;;  %s2498_s27 = scalar_lea.hbm %s4122_s3, 32 }
 0x388   : > { %p2495_p10 = scmp.ne.s32.totalorder %s4041_s7, %s2494_s28  ;;  %p2499_p13 = scmp.lt.u32.totalorder %s4041_s7, %s4122_s3 }
 0x389   : > { %p2500_p0 = scmp.lt.u32.totalorder %s2498_s27, %s2494_s28  ;;  %p2502_p2 = scmp.lt.u32.totalorder %s2494_s28, %s4041_s7 }
 0x38a   : > { %p2496_p11 = pnand %p2495_p10, %p2653_p5 }
 0x38b   : > { %p2501_p1 = por %p2500_p0, %p2499_p13 }
 0x38c   : > { %p2497_p12 = pneg %p2496_p11 }
 0x38d   : > { %p2503_p3 = por %p2502_p2, %p2501_p1 }
 0x38f   : > { %p2504_p4 = pnand %p2503_p3, %p2497_p12 }
 0x391   : > { %2507 = shalt.err (!%p2504_p4)
}
 0x392   : > { %2391 = dma.vmem_to_hbm [thread:$0]  (%p2653_p5), %s4043_s6, 16, %s4041_s7, %s4052_s9   ;;  %2069 = vst [vmem:[%s206_s22] sm:$0x1] %v2068_v12 }
 0x393   : > { %s2508_s10 = scalar_lea.vmem %s4050_s12, 16  ;;  %s2587_s13 = smov [#allocation7]  }
 0x394   : > { %p2509_p7 = scmp.ne.s32.totalorder %s4050_s12, %s2508_s10  ;;  %s2512_s14 = sshll.u32 %s2587_s13, 4  ;;  %s2513_s14 = int_to_ptr.vmem [resolvable:$false] %s2512_s14 }
 0x395   : > { %s2514_s23 = scalar_lea.vmem %s2513_s14, 32  ;;  %p2515_p10 = scmp.lt.s32.totalorder %s4050_s12, %s2513_s14 }
 0x396   : > { %p2510_p8 = pnand %p2509_p7, %p2653_p5  ;;  %p2516_p11 = scmp.lt.s32.totalorder %s2514_s23, %s2508_s10 }
 0x398   : > { %p2511_p9 = pneg %p2510_p8  ;;  %p2517_p12 = por %p2516_p11, %p2515_p10 }
 0x39a   : > { %p2518_p13 = pnand %p2517_p12, %p2511_p9 }
 0x39c   : > { %2521 = shalt.err (!%p2518_p13)
}
 0x39d   : > { %s2522_s5 = scalar_lea.hbm %s4048_s8, 16  ;;  %s2526_s7 = scalar_lea.hbm %s4123_s4, 32 }
 0x39e   : > { %p2523_p0 = scmp.ne.s32.totalorder %s4048_s8, %s2522_s5  ;;  %p2527_p3 = scmp.lt.u32.totalorder %s4048_s8, %s4123_s4 }
 0x39f   : > { %p2528_p4 = scmp.lt.u32.totalorder %s2526_s7, %s2522_s5  ;;  %p2530_p8 = scmp.lt.u32.totalorder %s2522_s5, %s4048_s8 }
 0x3a0   : > { %p2524_p1 = pnand %p2523_p0, %p2653_p5 }
 0x3a1   : > { %p2529_p7 = por %p2528_p4, %p2527_p3 }
 0x3a2   : > { %p2525_p2 = pneg %p2524_p1 }
 0x3a3   : > { %p2531_p9 = por %p2530_p8, %p2529_p7 }
 0x3a5   : > { %p2532_p10 = pnand %p2531_p9, %p2525_p2 }
 0x3a7   : > { %2535 = shalt.err (!%p2532_p10)
}
 0x3a8   : > { %2392 = dma.vmem_to_hbm [thread:$0]  (%p2653_p5), %s4050_s12, 16, %s4048_s8, %s4052_s9  }
 0x3a9 PF: > { %p2406_p11 = scmp.ge.s32.totalorder %s2574_s18, 2  ;;  %s2133_s30 = sand.u32 1, %s2562_s15  }
 0x3aa   : > { %s2134_s27 = scalar_lea.sflag [#allocation4], %s2133_s30 }
 0x3ab   : > { %p2397_p12 = pnand %p2406_p11, %p2657_p6 }
 0x3ad   : > { %2553 = dma.done.wait (!%p2397_p12), %s2134_s27, 4096  }
 0x3ae   : > { %2555 = vsyncadd (!%p2397_p12), %s2134_s27, 4294963200  ;;  %s2142_s19 = sand.u32 1, %s2233_s20  }
 0x3af   : > { %s2143_s11 = scalar_lea.sflag [#allocation6], %s2142_s19 }
 0x3b0   : > { %2557 = dma.done.wait (!%p2397_p12), %s2143_s11, 32  }
 0x3b1   : > { %2559 = vsyncadd (!%p2397_p12), %s2143_s11, 4294967264  ;;  %p18_p5 = scmp.ge.s32.totalorder %s2638_s21, 4   ;;  %s4126_s15 = smov %s2566_s16 }
 0x3b2   : > { %s4127_s16 = smov %s2570_s17  ;;  %s4128_s17 = smov %s2651_s24 }
 0x3b3   : > { %s4129_s18 = smov %s2638_s21  ;;  %20 = sbr.rel (!%p18_p5) target bundleno = 5 (0x5), region = 95 }
 0x3ba   :  { %2155 = vsyncpa [#allocation4], 1 }
 0x3bb   :  { %2157 = vsyncpa [#allocation4 + $0x1], 1 }
 0x3bc   :  { %2158 = vsyncpa [#allocation6], 1 }
 0x3bd   :  { %2160 = vsyncpa [#allocation6 + $0x1], 1 }

</bundles_post_ra>
